<compile_context>
chip_gen: v7x
topology: tpu7x:2x2x1
jax: 0.10.0
libtpu: 0.0.40
codegen_flags: <defaults>
</compile_context>

<pallas_src>
import jax
import jax.numpy as jnp
from jax.experimental import pallas as pl
from jax.experimental.pallas import tpu as pltpu

IN_DIM, H1, H2, H3, OUT_DIM = 34, 128, 512, 128, 1
K_PAD = 128          # lane-aligned feature dim used on the MXU
NEG_SLOPE = 0.1
MAX_TB = 2048        # max batch-tile rows (VMEM use stays well under scoped limits)


def _leaky_relu(x):
    # slope in (0, 1): leaky_relu(x) == max(x, slope * x)  -> 2 VPU ops.
    return jnp.maximum(x, NEG_SLOPE * x)


def mlp_kernel(x_ref, w1_ref, b1_ref, w2_ref, b2_ref, w3_ref, b3_ref,
               w4r_ref, b4_ref, o_ref, xpad_ref):
    # Zero-extend the streamed (tb, 34) bf16 tile to (tb, 128) in VMEM scratch.
    # Pad lanes are re-zeroed every step (cheap masked stores) so correctness does not
    # depend on program_id==0 running on every core when the grid is split (v7x megacore).
    tb = xpad_ref.shape[0]
    xpad_ref[:, IN_DIM:] = jnp.zeros((tb, K_PAD - IN_DIM), jnp.bfloat16)
    xpad_ref[:, :IN_DIM] = x_ref[...]
    x = xpad_ref[...]                                                     # (tb, 128) bf16

    h = jnp.dot(x, w1_ref[...], preferred_element_type=jnp.float32) + b1_ref[...]
    h = _leaky_relu(h)                                                    # (tb, 128) f32
    h = jnp.dot(h.astype(jnp.bfloat16), w2_ref[...],
                preferred_element_type=jnp.float32) + b2_ref[...]
    h = _leaky_relu(h)                                                    # (tb, 512) f32
    h = jnp.dot(h.astype(jnp.bfloat16), w3_ref[...],
                preferred_element_type=jnp.float32) + b3_ref[...]
    h = _leaky_relu(h)                                                    # (tb, 128) f32

    # Final 128 -> 1 layer as a VPU/XLU reduction instead of an N=1 MXU matmul.
    # Output kept as a (tb, 1) block: a lane-dense (1, tb) store would need an in-kernel
    # (tb,1)->(1,tb) relayout; output bytes are tiny, so keep the simple store.
    y = jnp.sum(h * w4r_ref[...], axis=-1, keepdims=True) + b4_ref[...]   # (tb, 1) f32
    o_ref[...] = y.astype(o_ref.dtype)


def _round_up(n, m):
    return -(-n // m) * m


def _plan(batch, max_tb=MAX_TB):
    """Pick (batch_tile, num_tiles): large tiles to amortize grid-step overhead, adaptive
    to small batches, and >= 2 tiles when there is enough work (v7x has 2 TensorCores)."""
    b128 = _round_up(max(batch, 1), 128)
    if b128 <= max_tb and batch <= 256:
        return b128, 1
    num_tiles = max(2, -(-b128 // max_tb))
    tb = _round_up(-(-batch // num_tiles), 128)
    num_tiles = -(-batch // tb)
    return tb, num_tiles


def prepare_params(params):
    """One-time conversion to kernel-ready layout/dtype (hoisted out of the per-call path)."""
    w1p = (jnp.zeros((K_PAD, H1), jnp.float32)
           .at[:IN_DIM, :].set(params["w1"].astype(jnp.float32))
           .astype(jnp.bfloat16))
    return dict(
        w1=w1p,
        b1=params["b1"].reshape(1, H1).astype(jnp.float32),
        w2=params["w2"].astype(jnp.bfloat16),
        b2=params["b2"].reshape(1, H2).astype(jnp.float32),
        w3=params["w3"].astype(jnp.bfloat16),
        b3=params["b3"].reshape(1, H3).astype(jnp.float32),
        w4r=params["w4"].reshape(1, H3).astype(jnp.float32),   # (1, 128) row for VPU reduce
        b4=params["b4"].reshape(1, OUT_DIM).astype(jnp.float32),
    )


def ai_model_dnn_forward(x, prep, *, max_tb=MAX_TB):
    """x: (B, 34) float32; prep: output of prepare_params(params)."""
    B = x.shape[0]
    tb, num_tiles = _plan(B, max_tb)
    b_pad = tb * num_tiles

    # Stream x unpadded in the feature dim and in bf16: no (B, 128) f32 HBM buffer.
    xb = x.astype(jnp.bfloat16)
    if b_pad != B:
        xb = jnp.pad(xb, ((0, b_pad - B), (0, 0)))

    full = lambda shape: pl.BlockSpec(shape, lambda i: (0, 0))

    out = pl.pallas_call(
        mlp_kernel,
        out_shape=jax.ShapeDtypeStruct((b_pad, OUT_DIM), x.dtype),
        grid_spec=pltpu.PrefetchScalarGridSpec(
            num_scalar_prefetch=0,
            grid=(num_tiles,),
            in_specs=[
                pl.BlockSpec((tb, IN_DIM), lambda i: (i, 0)),   # streamed (tb, 34) bf16 tile
                full((K_PAD, H1)), full((1, H1)),
                full((H1, H2)),    full((1, H2)),
                full((H2, H3)),    full((1, H3)),
                full((1, H3)),     full((1, OUT_DIM)),
            ],
            out_specs=pl.BlockSpec((tb, OUT_DIM), lambda i: (i, 0)),
            scratch_shapes=[pltpu.VMEM((tb, K_PAD), jnp.bfloat16)],
        ),
        compiler_params=pltpu.CompilerParams(
            dimension_semantics=("parallel",)),
    )(xb, prep["w1"], prep["b1"], prep["w2"], prep["b2"],
      prep["w3"], prep["b3"], prep["w4r"], prep["b4"])

    return out[:B]


def init_params(key):
    """Deterministic init mimicking torch.nn.Linear default (U[-1/sqrt(fan_in), +1/sqrt(fan_in)])."""
    dims = [(IN_DIM, H1), (H1, H2), (H2, H3), (H3, OUT_DIM)]
    params = {}
    keys = jax.random.split(key, 2 * len(dims))
    for idx, (fan_in, fan_out) in enumerate(dims):
        bound = 1.0 / (fan_in ** 0.5)
        wk, bk = keys[2 * idx], keys[2 * idx + 1]
        params[f"w{idx+1}"] = jax.random.uniform(
            wk, (fan_in, fan_out), jnp.float32, -bound, bound)
        params[f"b{idx+1}"] = jax.random.uniform(
            bk, (1, fan_out), jnp.float32, -bound, bound)
    return params


def reference_forward(x, p):
    h = _leaky_relu(x @ p["w1"] + p["b1"])
    h = _leaky_relu(h @ p["w2"] + p["b2"])
    h = _leaky_relu(h @ p["w3"] + p["b3"])
    return h @ p["w4"] + p["b4"]


if __name__ == "__main__":
    key = jax.random.PRNGKey(0)
    pkey, xkey = jax.random.split(key)
    params = init_params(pkey)
    prep = prepare_params(params)   # one-time, kernel-ready weights (reused across calls)

    B = 16  # small example batch; tiling adapts (tb=128 here, not 512/2048)
    x = jax.random.normal(xkey, (B, IN_DIM), jnp.float32)

    out = jax.block_until_ready(ai_model_dnn_forward(x, prep))

    ref = reference_forward(x, params)
    assert out.shape == (B, OUT_DIM)
    # bf16 weights/activations on the MXU with f32 accumulation: allow small deviation.
    assert jnp.allclose(out, ref, atol=5e-2, rtol=5e-2), "mismatch vs JAX reference"

    print("KERNEL_OK")
</pallas_src>

<mosaic_0001>
module attributes {stable_mosaic.version = 11 : i64} {
  func.func @mlp_kernel(%arg0: i32, %arg1: memref<128x34xbf16, #tpu.memory_space<vmem>>, %arg2: memref<128x128xbf16, #tpu.memory_space<vmem>>, %arg3: memref<1x128xf32, #tpu.memory_space<vmem>>, %arg4: memref<128x512xbf16, #tpu.memory_space<vmem>>, %arg5: memref<1x512xf32, #tpu.memory_space<vmem>>, %arg6: memref<512x128xbf16, #tpu.memory_space<vmem>>, %arg7: memref<1x128xf32, #tpu.memory_space<vmem>>, %arg8: memref<1x128xf32, #tpu.memory_space<vmem>>, %arg9: memref<1x1xf32, #tpu.memory_space<vmem>>, %arg10: memref<128x1xf32, #tpu.memory_space<vmem>>, %arg11: memref<128x128xbf16, #tpu.memory_space<vmem>>) attributes {dimension_semantics = [#tpu.dimension_semantics<parallel>], iteration_bounds = array<i64: 1>, scalar_prefetch = 0 : i64, scratch_operands = 1 : i64, tpu.core_type = #tpu.core_type<tc>, window_params = [{transform_indices = @transform_0, window_bounds = array<i64: 128, 34>}, {pipeline_mode = #tpu.pipeline_mode<synchronous>, transform_indices = @transform_1, window_bounds = array<i64: 128, 128>}, {pipeline_mode = #tpu.pipeline_mode<synchronous>, transform_indices = @transform_2, window_bounds = array<i64: 1, 128>}, {pipeline_mode = #tpu.pipeline_mode<synchronous>, transform_indices = @transform_3, window_bounds = array<i64: 128, 512>}, {pipeline_mode = #tpu.pipeline_mode<synchronous>, transform_indices = @transform_4, window_bounds = array<i64: 1, 512>}, {pipeline_mode = #tpu.pipeline_mode<synchronous>, transform_indices = @transform_5, window_bounds = array<i64: 512, 128>}, {pipeline_mode = #tpu.pipeline_mode<synchronous>, transform_indices = @transform_6, window_bounds = array<i64: 1, 128>}, {pipeline_mode = #tpu.pipeline_mode<synchronous>, transform_indices = @transform_7, window_bounds = array<i64: 1, 128>}, {pipeline_mode = #tpu.pipeline_mode<synchronous>, transform_indices = @transform_8, window_bounds = array<i64: 1, 1>}, {transform_indices = @transform_9, window_bounds = array<i64: 128, 1>}]} {
    %cst = arith.constant 0.000000e+00 : bf16
    %0 = vector.broadcast %cst : bf16 to vector<128x94xbf16>
    %c0 = arith.constant 0 : index
    %c34 = arith.constant 34 : index
    %1 = vector.load %arg11[%c0, %c34] : memref<128x128xbf16, #tpu.memory_space<vmem>>, vector<128x94xbf16>
    tpu.vector_store %arg11[%c0, %c34], %0 {strides = array<i32>} : memref<128x128xbf16, #tpu.memory_space<vmem>>, vector<128x94xbf16>,
    %c0_0 = arith.constant 0 : index
    %c0_1 = arith.constant 0 : index
    %2 = vector.load %arg1[%c0_0, %c0_1] : memref<128x34xbf16, #tpu.memory_space<vmem>>, vector<128x34xbf16>
    %c0_2 = arith.constant 0 : index
    %c0_3 = arith.constant 0 : index
    %3 = vector.load %arg11[%c0_2, %c0_3] : memref<128x128xbf16, #tpu.memory_space<vmem>>, vector<128x34xbf16>
    tpu.vector_store %arg11[%c0_2, %c0_3], %2 {strides = array<i32>} : memref<128x128xbf16, #tpu.memory_space<vmem>>, vector<128x34xbf16>,
    %c0_4 = arith.constant 0 : index
    %c0_5 = arith.constant 0 : index
    %4 = vector.load %arg11[%c0_4, %c0_5] : memref<128x128xbf16, #tpu.memory_space<vmem>>, vector<128x128xbf16>
    %c0_6 = arith.constant 0 : index
    %c0_7 = arith.constant 0 : index
    %5 = vector.load %arg2[%c0_6, %c0_7] : memref<128x128xbf16, #tpu.memory_space<vmem>>, vector<128x128xbf16>
    %cst_8 = arith.constant dense<0.000000e+00> : vector<128x128xf32>
    %6 = tpu.matmul %4, %5, %cst_8 {dimension_numbers = #tpu.dot_dimension_numbers<[1], [0], [0], [1], [0, 0, 1, 1], [], []>} : vector<128x128xbf16>, vector<128x128xbf16>, vector<128x128xf32> -> vector<128x128xf32>
    %c0_9 = arith.constant 0 : index
    %c0_10 = arith.constant 0 : index
    %7 = vector.load %arg3[%c0_9, %c0_10] : memref<1x128xf32, #tpu.memory_space<vmem>>, vector<1x128xf32>
    %8 = vector.broadcast %7 : vector<1x128xf32> to vector<128x128xf32>
    %9 = arith.addf %6, %8 : vector<128x128xf32>
    %cst_11 = arith.constant 1.000000e-01 : f32
    %10 = vector.broadcast %cst_11 : f32 to vector<128x128xf32>
    %11 = arith.mulf %10, %9 : vector<128x128xf32>
    %12 = arith.maximumf %9, %11 : vector<128x128xf32>
    %13 = arith.truncf %12 : vector<128x128xf32> to vector<128x128xbf16>
    %c0_12 = arith.constant 0 : index
    %c0_13 = arith.constant 0 : index
    %14 = vector.load %arg4[%c0_12, %c0_13] : memref<128x512xbf16, #tpu.memory_space<vmem>>, vector<128x512xbf16>
    %cst_14 = arith.constant dense<0.000000e+00> : vector<128x512xf32>
    %15 = tpu.matmul %13, %14, %cst_14 {dimension_numbers = #tpu.dot_dimension_numbers<[1], [0], [0], [1], [0, 0, 1, 1], [], []>} : vector<128x128xbf16>, vector<128x512xbf16>, vector<128x512xf32> -> vector<128x512xf32>
    %c0_15 = arith.constant 0 : index
    %c0_16 = arith.constant 0 : index
    %16 = vector.load %arg5[%c0_15, %c0_16] : memref<1x512xf32, #tpu.memory_space<vmem>>, vector<1x512xf32>
    %17 = vector.broadcast %16 : vector<1x512xf32> to vector<128x512xf32>
    %18 = arith.addf %15, %17 : vector<128x512xf32>
    %cst_17 = arith.constant 1.000000e-01 : f32
    %19 = vector.broadcast %cst_17 : f32 to vector<128x512xf32>
    %20 = arith.mulf %19, %18 : vector<128x512xf32>
    %21 = arith.maximumf %18, %20 : vector<128x512xf32>
    %22 = arith.truncf %21 : vector<128x512xf32> to vector<128x512xbf16>
    %c0_18 = arith.constant 0 : index
    %c0_19 = arith.constant 0 : index
    %23 = vector.load %arg6[%c0_18, %c0_19] : memref<512x128xbf16, #tpu.memory_space<vmem>>, vector<512x128xbf16>
    %cst_20 = arith.constant dense<0.000000e+00> : vector<128x128xf32>
    %24 = tpu.matmul %22, %23, %cst_20 {dimension_numbers = #tpu.dot_dimension_numbers<[1], [0], [0], [1], [0, 0, 1, 1], [], []>} : vector<128x512xbf16>, vector<512x128xbf16>, vector<128x128xf32> -> vector<128x128xf32>
    %c0_21 = arith.constant 0 : index
    %c0_22 = arith.constant 0 : index
    %25 = vector.load %arg7[%c0_21, %c0_22] : memref<1x128xf32, #tpu.memory_space<vmem>>, vector<1x128xf32>
    %26 = vector.broadcast %25 : vector<1x128xf32> to vector<128x128xf32>
    %27 = arith.addf %24, %26 : vector<128x128xf32>
    %cst_23 = arith.constant 1.000000e-01 : f32
    %28 = vector.broadcast %cst_23 : f32 to vector<128x128xf32>
    %29 = arith.mulf %28, %27 : vector<128x128xf32>
    %30 = arith.maximumf %27, %29 : vector<128x128xf32>
    %c0_24 = arith.constant 0 : index
    %c0_25 = arith.constant 0 : index
    %31 = vector.load %arg8[%c0_24, %c0_25] : memref<1x128xf32, #tpu.memory_space<vmem>>, vector<1x128xf32>
    %32 = vector.broadcast %31 : vector<1x128xf32> to vector<128x128xf32>
    %33 = arith.mulf %30, %32 : vector<128x128xf32>
    %cst_26 = arith.constant dense<0.000000e+00> : vector<128xf32>
    %34 = vector.multi_reduction <add>, %33, %cst_26 [1] : vector<128x128xf32> to vector<128xf32>
    %35 = vector.shape_cast %34 : vector<128xf32> to vector<128x1xf32>
    %c0_27 = arith.constant 0 : index
    %c0_28 = arith.constant 0 : index
    %36 = vector.load %arg9[%c0_27, %c0_28] : memref<1x1xf32, #tpu.memory_space<vmem>>, vector<1x1xf32>
    %37 = vector.broadcast %36 : vector<1x1xf32> to vector<128x1xf32>
    %38 = arith.addf %35, %37 : vector<128x1xf32>
    %c0_29 = arith.constant 0 : index
    %c0_30 = arith.constant 0 : index
    %39 = vector.load %arg10[%c0_29, %c0_30] : memref<128x1xf32, #tpu.memory_space<vmem>>, vector<128x1xf32>
    tpu.vector_store %arg10[%c0_29, %c0_30], %38 {strides = array<i32>} : memref<128x1xf32, #tpu.memory_space<vmem>>, vector<128x1xf32>,
    return
  }
  func.func @transform_0(%arg0: i32) -> (i32, i32) {
    %c0_i32 = arith.constant 0 : i32
    %c0_i32_0 = arith.constant 0 : i32
    return %arg0, %c0_i32 : i32, i32
  }
  func.func @transform_1(%arg0: i32) -> (i32, i32) {
    %c0_i32 = arith.constant 0 : i32
    %c0_i32_0 = arith.constant 0 : i32
    %c0_i32_1 = arith.constant 0 : i32
    return %c0_i32, %c0_i32_0 : i32, i32
  }
  func.func @transform_2(%arg0: i32) -> (i32, i32) {
    %c0_i32 = arith.constant 0 : i32
    %c0_i32_0 = arith.constant 0 : i32
    %c0_i32_1 = arith.constant 0 : i32
    return %c0_i32, %c0_i32_0 : i32, i32
  }
  func.func @transform_3(%arg0: i32) -> (i32, i32) {
    %c0_i32 = arith.constant 0 : i32
    %c0_i32_0 = arith.constant 0 : i32
    %c0_i32_1 = arith.constant 0 : i32
    return %c0_i32, %c0_i32_0 : i32, i32
  }
  func.func @transform_4(%arg0: i32) -> (i32, i32) {
    %c0_i32 = arith.constant 0 : i32
    %c0_i32_0 = arith.constant 0 : i32
    %c0_i32_1 = arith.constant 0 : i32
    return %c0_i32, %c0_i32_0 : i32, i32
  }
  func.func @transform_5(%arg0: i32) -> (i32, i32) {
    %c0_i32 = arith.constant 0 : i32
    %c0_i32_0 = arith.constant 0 : i32
    %c0_i32_1 = arith.constant 0 : i32
    return %c0_i32, %c0_i32_0 : i32, i32
  }
  func.func @transform_6(%arg0: i32) -> (i32, i32) {
    %c0_i32 = arith.constant 0 : i32
    %c0_i32_0 = arith.constant 0 : i32
    %c0_i32_1 = arith.constant 0 : i32
    return %c0_i32, %c0_i32_0 : i32, i32
  }
  func.func @transform_7(%arg0: i32) -> (i32, i32) {
    %c0_i32 = arith.constant 0 : i32
    %c0_i32_0 = arith.constant 0 : i32
    %c0_i32_1 = arith.constant 0 : i32
    return %c0_i32, %c0_i32_0 : i32, i32
  }
  func.func @transform_8(%arg0: i32) -> (i32, i32) {
    %c0_i32 = arith.constant 0 : i32
    %c0_i32_0 = arith.constant 0 : i32
    %c0_i32_1 = arith.constant 0 : i32
    return %c0_i32, %c0_i32_0 : i32, i32
  }
  func.func @transform_9(%arg0: i32) -> (i32, i32) {
    %c0_i32 = arith.constant 0 : i32
    %c0_i32_0 = arith.constant 0 : i32
    return %arg0, %c0_i32 : i32, i32
  }
}

</mosaic_0001>

<bundles_post_ra>
// kernel: tpu_custom_call.1
= control target key start
LH: loop header
LB: loop body
LE: loop exit
PB: predicated region body
PF: predicated region fallthrough
CT: control target
= control target key end

     0   :  { %s2412_s0 = inlined_call_operand.vmem [shape: bf16[128,34], index: 0, kind: input, shape index: {}]   ;;  %s2413_s1 = inlined_call_operand.vmem [shape: bf16[128,128], index: 1, kind: input, shape index: {}]   ;;  %s2414_s2 = inlined_call_operand.vmem [shape: f32[1,128], index: 2, kind: input, shape index: {}]   ;;  %s2415_s3 = inlined_call_operand.hbm [shape: bf16[128,512], index: 3, kind: input, shape index: {}]   ;;  %s2416_s4 = inlined_call_operand.vmem [shape: f32[1,512], index: 4, kind: input, shape index: {}]   ;;  %s2417_s5 = inlined_call_operand.hbm [shape: bf16[512,128], index: 5, kind: input, shape index: {}]   ;;  %s2418_s6 = inlined_call_operand.vmem [shape: f32[1,128], index: 6, kind: input, shape index: {}]   ;;  %s2419_s7 = inlined_call_operand.vmem [shape: f32[1,128], index: 7, kind: input, shape index: {}]   ;;  %s2420_s8 = inlined_call_operand.<no memory space> [shape: f32[1,1], index: 8, kind: input, shape index: {}]   ;;  %s2421_s9 = inlined_call_operand.vmem [shape: f32[128,1], index: 9, kind: output, shape index: {}]  }
   0x1   :  { %v14_v0 = vstv %s2420_s8 }
   0x2   :  { %15 = vst [vmem:[#allocation3] sm:$0x1] %v14_v0 }
   0x3   :  { %16 = vsyncpa [#allocation5], 0 }
   0x4   :  { %17 = vsyncpa [#allocation7], 0  ;;  %s1978_s11 = smov [#allocation4]   ;;  %s1930_s15 = scalar_lea.hbm %s2415_s3, 4096 }
   0x5   :  { %s29_s12 = sshll.u32 %s1978_s11, 4  ;;  %p1931_p0 = scmp.ne.s32.totalorder %s2415_s3, %s1930_s15  ;;  %s30_s12 = int_to_ptr.vmem [resolvable:$true] %s29_s12 }
   0x6   :  { %p1934_p1 = scmp.lt.u32.totalorder %s1930_s15, %s2415_s3 }
   0x8   :  { %p1936_p2 = pnand %p1934_p1, %p1931_p0 }
   0xa   :  { %1939 = shalt.err (!%p1936_p2)
}
   0xb   :  { %s1940_s8 = scalar_lea.vmem %s30_s12, 4096  ;;  %p1945_p4 = scmp.lt.s32.totalorder %s30_s12, %s30_s12 }
   0xc   :  { %p1941_p3 = scmp.ne.s32.totalorder %s30_s12, %s1940_s8  ;;  %p1946_p5 = scmp.lt.s32.totalorder %s1940_s8, %s1940_s8 }
   0xe   :  { %p1947_p6 = por %p1946_p5, %p1945_p4 }
  0x10   :  { %p1948_p7 = pnand %p1947_p6, %p1941_p3 }
  0x12   :  { %1951 = shalt.err (!%p1948_p7)
}
  0x13   :  { %s1979_s20 = smov 256   ;;  %s1980_s21 = smov 16  }
  0x14   :  { %35 = dma.hbm_to_vmem [thread:$0]  %s2415_s3, 4096, %s30_s12, [#allocation5], %s1979_s20, %s1979_s20, %s1980_s21  }
  0x15   :  { %s1981_s24 = smov [#allocation6]   ;;  %s1952_s28 = scalar_lea.hbm %s2417_s5, 4096 }
  0x16   :  { %s43_s25 = sshll.u32 %s1981_s24, 4  ;;  %p1953_p8 = scmp.ne.s32.totalorder %s2417_s5, %s1952_s28  ;;  %s44_s25 = int_to_ptr.vmem [resolvable:$true] %s43_s25 }
  0x17   :  { %p1956_p9 = scmp.lt.u32.totalorder %s1952_s28, %s2417_s5 }
  0x19   :  { %p1958_p10 = pnand %p1956_p9, %p1953_p8 }
  0x1b   :  { %1961 = shalt.err (!%p1958_p10)
}
  0x1c   :  { %s1962_s13 = scalar_lea.vmem %s44_s25, 4096  ;;  %p1967_p12 = scmp.lt.s32.totalorder %s44_s25, %s44_s25 }
  0x1d   :  { %p1963_p11 = scmp.ne.s32.totalorder %s44_s25, %s1962_s13  ;;  %p1968_p13 = scmp.lt.s32.totalorder %s1962_s13, %s1962_s13 }
  0x1f   :  { %p1969_p0 = por %p1968_p13, %p1967_p12 }
  0x21   :  { %p1970_p1 = pnand %p1969_p0, %p1963_p11 }
  0x23   :  { %1973 = shalt.err (!%p1970_p1)
}
  0x24   :  { %s1982_s3 = smov 64   ;;  %s1983_s12 = smov 4  }
  0x25   :  { %49 = dma.hbm_to_vmem [thread:$0]  %s2417_s5, 4096, %s44_s25, [#allocation7], %s1982_s3, %s1982_s3, %s1983_s12  }
  0x26   :  { %1974 = dma.done.wait [#allocation5], 4096  }
  0x27   :  { %1975 = vsyncadd [#allocation5], 4294963200 }
  0x28   :  { %1976 = dma.done.wait [#allocation7], 4096  }
  0x29   :  { %1977 = vsyncadd [#allocation7], 4294963200  ;;  %vm63_vm0 = vcmask 1047824   ;;  %v1984_v1 = vmov 0   ;;  %v1834_v2 = vld [vmem:[%s2413_s1] sm:$0xff]   ;;  %v1835_v3 = vld [vmem:[%s2413_s1 + $0x8] sm:$0xff]  }
  0x2a   :  { %64 = vst.msk [vmem:[#allocation2] sm:$0xff] %vm63_vm0, %v1984_v1  ;;  %65 = vst.msk [vmem:[#allocation2 + $0x8] sm:$0xff] %vm63_vm0, %v1984_v1  ;;  %607 = vmatprep.mubr.bf16.mxu1 %v1984_v1  ;;  %1779 = vmatprep.subr.bf16.mxu0 %v1834_v2  ;;  %v1836_v4 = vld [vmem:[%s2413_s1 + $0x10] sm:$0xff]   ;;  %v1837_v5 = vld [vmem:[%s2413_s1 + $0x18] sm:$0xff]   ;;  %vm136_vm1 = vcmask 277504   ;;  %vm1528_vm2 = vcmask 7168  }
  0x2b   :  { %66 = vst.msk [vmem:[#allocation2 + $0x10] sm:$0xff] %vm63_vm0, %v1984_v1  ;;  %67 = vst.msk [vmem:[#allocation2 + $0x18] sm:$0xff] %vm63_vm0, %v1984_v1  ;;  %1780 = vmatpush3.bf16.msra.mxu0 %v1834_v2  ;;  %v1842_v6 = vld [vmem:[%s2412_s0] sm:$0xff]   ;;  %v1843_v7 = vld [vmem:[%s2412_s0 + $0x8] sm:$0xff]  }
  0x2c   :  { %68 = vst.msk [vmem:[#allocation2 + $0x20] sm:$0xff] %vm63_vm0, %v1984_v1  ;;  %69 = vst.msk [vmem:[#allocation2 + $0x28] sm:$0xff] %vm63_vm0, %v1984_v1  ;;  %1781 = vmatprep.subr.bf16.mxu0 %v1835_v3  ;;  %v1838_v8 = vld [vmem:[%s2413_s1 + $0x20] sm:$0xff]   ;;  %v1844_v9 = vld [vmem:[%s2412_s0 + $0x10] sm:$0xff]  }
  0x2d   :  { %70 = vst.msk [vmem:[#allocation2 + $0x30] sm:$0xff] %vm63_vm0, %v1984_v1  ;;  %71 = vst.msk [vmem:[#allocation2 + $0x38] sm:$0xff] %vm63_vm0, %v1984_v1  ;;  %v1845_v10 = vld [vmem:[%s2412_s0 + $0x18] sm:$0xff]   ;;  %v1846_v11 = vld [vmem:[%s2412_s0 + $0x20] sm:$0xff]  }
  0x2e   :  { %137 = vst.msk [vmem:[#allocation2] sm:$0xff] %vm136_vm1, %v1842_v6  ;;  %138 = vst.msk [vmem:[#allocation2 + $0x8] sm:$0xff] %vm136_vm1, %v1843_v7  ;;  %v1847_v12 = vld [vmem:[%s2412_s0 + $0x28] sm:$0xff]   ;;  %v1848_v14 = vld [vmem:[%s2412_s0 + $0x30] sm:$0xff]  }
  0x2f   :  { %1782 = vmatpush3.bf16.msra.mxu0 %v1835_v3  ;;  %139 = vst.msk [vmem:[#allocation2 + $0x10] sm:$0xff] %vm136_vm1, %v1844_v9  ;;  %140 = vst.msk [vmem:[#allocation2 + $0x18] sm:$0xff] %vm136_vm1, %v1845_v10  ;;  %v1839_v13 = vld [vmem:[%s2413_s1 + $0x28] sm:$0xff]   ;;  %v1849_v15 = vld [vmem:[%s2412_s0 + $0x38] sm:$0xff]  }
  0x30   :  { %1783 = vmatprep.subr.bf16.mxu0 %v1836_v4  ;;  %141 = vst.msk [vmem:[#allocation2 + $0x20] sm:$0xff] %vm136_vm1, %v1846_v11  ;;  %142 = vst.msk [vmem:[#allocation2 + $0x28] sm:$0xff] %vm136_vm1, %v1847_v12  ;;  %v1850_v16 = vld [vmem:[#allocation4 + $0x4] ss:$16 sps:$4 sm:$0xff]   ;;  %v1855_v18 = vld [vmem:[#allocation4] ss:$16 sps:$4 sm:$0xff]  }
  0x31   :  { %143 = vst.msk [vmem:[#allocation2 + $0x30] sm:$0xff] %vm136_vm1, %v1848_v14  ;;  %144 = vst.msk [vmem:[#allocation2 + $0x38] sm:$0xff] %vm136_vm1, %v1849_v15  ;;  %575 = vmatprep.subr.bf16.mxu1 %v1850_v16  ;;  %v1840_v19 = vld [vmem:[%s2413_s1 + $0x30] sm:$0xff]   ;;  %v1841_v22 = vld [vmem:[%s2413_s1 + $0x38] sm:$0xff]  }
  0x32   :  { %v1856_v20 = vld [vmem:[#allocation4 + $0x24] ss:$16 sps:$4 sm:$0xff]   ;;  %576 = vmatpush1.bf16.msra.mxu1 %v1855_v18  ;;  %v1861_v21 = vld [vmem:[#allocation4 + $0x20] ss:$16 sps:$4 sm:$0xff]   ;;  %v1854_v26 = vld [vmem:[#allocation4 + $0xc] ss:$16 sps:$4 sm:$0xff]  }
  0x33   :  { %1784 = vmatpush3.bf16.msra.mxu0 %v1836_v4  ;;  %577 = vmatprep.subr.bf16.mxu1 %v1856_v20  ;;  %v1862_v23 = vld [vmem:[#allocation4 + $0x44] ss:$16 sps:$4 sm:$0xff]   ;;  %v1867_v24 = vld [vmem:[#allocation4 + $0x40] ss:$16 sps:$4 sm:$0xff]   ;;  %v1852_v28 = vld [vmem:[#allocation4 + $0x8] ss:$16 sps:$4 sm:$0xff]  }
  0x34   :  { %1785 = vmatprep.subr.bf16.mxu0 %v1837_v5  ;;  %v1868_v25 = vld [vmem:[#allocation4 + $0x64] ss:$16 sps:$4 sm:$0xff]   ;;  %v1873_v29 = vld [vmem:[#allocation4 + $0x60] ss:$16 sps:$4 sm:$0xff]   ;;  %v1860_v32 = vld [vmem:[#allocation4 + $0x2c] ss:$16 sps:$4 sm:$0xff]  }
  0x35   :  { %v145_v17 = vld [vmem:[#allocation2] sm:$0xff]  ;;  %v146_v27 = vld [vmem:[#allocation2 + $0x8] sm:$0xff] }
  0x36   :  { %1795 = vmatprep.mubr.bf16.mxu0 %v145_v17  ;;  %578 = vmatpush1.bf16.msra.mxu1 %v1861_v21  ;;  %v1874_v30 = vld [vmem:[#allocation4 + $0x84] ss:$16 sps:$4 sm:$0xff]   ;;  %v1879_v33 = vld [vmem:[#allocation4 + $0x80] ss:$16 sps:$4 sm:$0xff]   ;;  %v1858_v34 = vld [vmem:[#allocation4 + $0x28] ss:$16 sps:$4 sm:$0xff]  }
  0x37   :  { %1786 = vmatpush3.bf16.msra.mxu0 %v1837_v5  ;;  %579 = vmatprep.subr.bf16.mxu1 %v1862_v23  ;;  %v147_v31 = vld [vmem:[#allocation2 + $0x10] sm:$0xff]  ;;  %v148_v36 = vld [vmem:[#allocation2 + $0x18] sm:$0xff]  ;;  %v149_v38 = vld [vmem:[#allocation2 + $0x20] sm:$0xff] }
  0x38   :  { %1787 = vmatprep.subr.bf16.mxu0 %v1838_v8  ;;  %v1866_v35 = vld [vmem:[#allocation4 + $0x4c] ss:$16 sps:$4 sm:$0xff]   ;;  %v1864_v37 = vld [vmem:[#allocation4 + $0x48] ss:$16 sps:$4 sm:$0xff]   ;;  %v1880_v46 = vld [vmem:[#allocation4 + $0xa4] ss:$16 sps:$4 sm:$0xff]  }
  0x39   :  { %v1872_v39 = vld [vmem:[#allocation4 + $0x6c] ss:$16 sps:$4 sm:$0xff]   ;;  %v1870_v40 = vld [vmem:[#allocation4 + $0x68] ss:$16 sps:$4 sm:$0xff]   ;;  %v1885_v49 = vld [vmem:[#allocation4 + $0xa0] ss:$16 sps:$4 sm:$0xff]  }
  0x3a   :  { %580 = vmatpush1.bf16.msra.mxu1 %v1867_v24  ;;  %v1878_v41 = vld [vmem:[#allocation4 + $0x8c] ss:$16 sps:$4 sm:$0xff]   ;;  %v1876_v43 = vld [vmem:[#allocation4 + $0x88] ss:$16 sps:$4 sm:$0xff]   ;;  %v1886_v50 = vld [vmem:[#allocation4 + $0xc4] ss:$16 sps:$4 sm:$0xff]  }
  0x3b   :  { %1788 = vmatpush3.bf16.msra.mxu0 %v1838_v8  ;;  %581 = vmatprep.subr.bf16.mxu1 %v1868_v25  ;;  %v150_v42 = vld [vmem:[#allocation2 + $0x28] sm:$0xff]  ;;  %v151_v44 = vld [vmem:[#allocation2 + $0x30] sm:$0xff]  ;;  %v152_v45 = vld [vmem:[#allocation2 + $0x38] sm:$0xff] }
  0x3c   :  { %1789 = vmatprep.subr.bf16.mxu0 %v1839_v13  ;;  %v1884_v47 = vld [vmem:[#allocation4 + $0xac] ss:$16 sps:$4 sm:$0xff]   ;;  %v1882_v48 = vld [vmem:[#allocation4 + $0xa8] ss:$16 sps:$4 sm:$0xff]   ;;  %v1891_v53 = vld [vmem:[#allocation4 + $0xc0] ss:$16 sps:$4 sm:$0xff]  }
  0x3d   :  { %v1890_v51 = vld [vmem:[#allocation4 + $0xcc] ss:$16 sps:$4 sm:$0xff]   ;;  %v1888_v52 = vld [vmem:[#allocation4 + $0xc8] ss:$16 sps:$4 sm:$0xff]   ;;  %v1892_v54 = vld [vmem:[#allocation4 + $0xe4] ss:$16 sps:$4 sm:$0xff]  }
  0x3e   :  { %582 = vmatpush1.bf16.msra.mxu1 %v1873_v29  ;;  %v1896_v55 = vld [vmem:[#allocation4 + $0xec] ss:$16 sps:$4 sm:$0xff]   ;;  %v1894_v56 = vld [vmem:[#allocation4 + $0xe8] ss:$16 sps:$4 sm:$0xff]   ;;  %v1897_v57 = vld [vmem:[#allocation4 + $0xe0] ss:$16 sps:$4 sm:$0xff]  }
  0x3f   :  { %1790 = vmatpush3.bf16.msra.mxu0 %v1839_v13  ;;  %583 = vmatprep.subr.bf16.mxu1 %v1874_v30  ;;  %v1898_v58 = vld [vmem:[#allocation6 + $0x40] sm:$0xff]   ;;  %v2134_v60 = vld [vmem:[%s2414_s2] ss:$0 sm:$0xff] }
  0x40   :  { %1791 = vmatprep.subr.bf16.mxu0 %v1840_v19  ;;  %v2128_v59 = vld [vmem:[#allocation6 + $0xc0] sm:$0xff]  }
  0x41   :  { %v1899_v21 = vld [vmem:[#allocation6] sm:$0xff]  }
  0x42   :  { %584 = vmatpush1.bf16.msra.mxu1 %v1879_v33 }
  0x43   :  { %1792 = vmatpush3.bf16.msra.mxu0 %v1840_v19  ;;  %585 = vmatprep.subr.bf16.mxu1 %v1880_v46 }
  0x44   :  { %1793 = vmatprep.subr.bf16.mxu0 %v1841_v22 }
  0x46   :  { %586 = vmatpush1.bf16.msra.mxu1 %v1885_v49 }
  0x47   :  { %1794 = vmatpush3.bf16.msra.mxu0 %v1841_v22  ;;  %587 = vmatprep.subr.bf16.mxu1 %v1886_v50  ;;  %v2142_v22 = vld [vmem:[#allocation6 + $0x80] sm:$0xff]  }
  0x48   :  { %688 = vmatprep.subr.bf16.mxu0 %v1854_v26  ;;  %v1900_v26 = vld [vmem:[#allocation6 + $0x48] sm:$0xff]  }
  0x4a   :  { %1796 = vmatmul.mubr.bf16.vlgmr.msra.gmra.mrb[0].mxu0 %v146_v27  ;;  %588 = vmatpush1.bf16.msra.mxu1 %v1891_v53  ;;  %v2145_v27 = vld [vmem:[#allocation6 + $0xc8] sm:$0xff]   ;;  %v2165_v53 = vld [vmem:[#allocation6 + $0xd8] sm:$0xff]  }
  0x4b   :  { %1799 = vmatprep.mubr.bf16.mxu0 %v147_v31  ;;  %689 = vmatpush1.bf16.msra.mxu0 %v1852_v28 }
  0x4c   :  { %690 = vmatprep.subr.bf16.mxu0 %v1860_v32  ;;  %589 = vmatprep.subr.bf16.mxu1 %v1892_v54 }
  0x4e   :  { %590 = vmatpush1.bf16.msra.mxu1 %v1897_v57 }
  0x4f   :  { %691 = vmatpush1.bf16.msra.mxu0 %v1858_v34  ;;  %1651 = vmatprep.subr.bf16.mxu1 %v1898_v58  ;;  %v1901_v34 = vld [vmem:[#allocation6 + $0x8] sm:$0xff]  }
  0x50   :  { %692 = vmatprep.subr.bf16.mxu0 %v1866_v35  ;;  %v2151_v35 = vld [vmem:[#allocation6 + $0x88] sm:$0xff]  }
  0x52   :  { %1800 = vmatmul.mubr.bf16.gmra.mrb[4].mxu0 %v148_v36 }
  0x53   :  { %1803 = vmatprep.mubr.bf16.mxu0 %v149_v38  ;;  %693 = vmatpush1.bf16.msra.mxu0 %v1864_v37  ;;  %v1902_v37 = vld [vmem:[#allocation6 + $0x50] sm:$0xff]  }
  0x54   :  { %694 = vmatprep.subr.bf16.mxu0 %v1872_v39  ;;  %v2154_v38 = vld [vmem:[#allocation6 + $0xd0] sm:$0xff]  }
  0x57   :  { %695 = vmatpush1.bf16.msra.mxu0 %v1870_v40 }
  0x58   :  { %696 = vmatprep.subr.bf16.mxu0 %v1878_v41 }
  0x5a   :  { %1804 = vmatmul.mubr.bf16.gmra.mrb[8].mxu0 %v150_v42 }
  0x5b   :  { %1807 = vmatprep.mubr.bf16.mxu0 %v151_v44  ;;  %697 = vmatpush1.bf16.msra.mxu0 %v1876_v43 }
  0x5c   :  { %698 = vmatprep.subr.bf16.mxu0 %v1884_v47  ;;  %v1903_v47 = vld [vmem:[#allocation6 + $0x10] sm:$0xff]  }
  0x5f   :  { %699 = vmatpush1.bf16.msra.mxu0 %v1882_v48  ;;  %v2161_v48 = vld [vmem:[#allocation6 + $0x90] sm:$0xff]  }
  0x60   :  { %700 = vmatprep.subr.bf16.mxu0 %v1890_v51 }
  0x62   :  { %1808 = vmatmul.mubr.bf16.gmra.mrb[12].mxu0 %v152_v45 }
  0x63   :  { %720 = vmatprep.mubr.bf16.mxu0 %v1984_v1  ;;  %701 = vmatpush1.bf16.msra.mxu0 %v1888_v52  ;;  %v1904_v52 = vld [vmem:[#allocation6 + $0x58] sm:$0xff]  }
  0x64   :  { %702 = vmatprep.subr.bf16.mxu0 %v1896_v55 }
  0x67   :  { %703 = vmatpush1.bf16.msra.mxu0 %v1894_v56 }
  0x68   :  { %1715 = vmatprep.subr.bf16.mxu0 %v2128_v59 }
 0x11d   :  { %v1797_v61 = vpop.f32.mrb[0].mxu0 }
 0x11e   :  { %v267_v62 = vadd.f32 %v1797_v61, %v2134_v60  ;;  %v258_v63 = vpop.f32.mrb[1].mxu0 }
 0x11f   :  { %v259_v0 = vadd.f32 %v2134_v60, %v258_v63  ;;  %v1798_v2 = vpop.f32.mrb[2].mxu0  ;;  %v2171_v63 = vld [vmem:[#allocation6 + $0x98] sm:$0xff]  }
 0x120   :  { %v323_v3 = vmul.f32 0.1, %v267_v62  ;;  %v270_v4 = vadd.f32 %v1798_v2, %v2134_v60  ;;  %v261_v5 = vpop.f32.mrb[3].mxu0  ;;  %v1908_v2 = vld [vmem:[#allocation6 + $0x60] sm:$0xff]  }
 0x121   :  { %v321_v6 = vmul.f32 0.1, %v259_v0  ;;  %v262_v7 = vadd.f32 %v2134_v60, %v261_v5 }
 0x122   :  { %v324_v8 = vmul.f32 0.1, %v270_v4  ;;  %v339_v10 = vmax.f32 %v267_v62, %v323_v3  ;;  %v1906_v62 = vld [vmem:[#allocation6 + $0x18] sm:$0xff]   ;;  %v2174_v3 = vld [vmem:[#allocation6 + $0xe0] sm:$0xff]  }
 0x123   :  { %v322_v9 = vmul.f32 0.1, %v262_v7  ;;  %v337_v12 = vmax.f32 %v259_v0, %v321_v6 }
 0x124   :  { %v340_v11 = vmax.f32 %v270_v4, %v324_v8 }
 0x125   :  { %v338_v13 = vmax.f32 %v262_v7, %v322_v9  ;;  %v1801_v14 = vpop.f32.mrb[4].mxu0 }
 0x126   :  { %v283_v15 = vadd.f32 %v1801_v14, %v2134_v60  ;;  %v274_v16 = vpop.f32.mrb[5].mxu0  ;;  %v354_v17 = vpack.c.bf16 %v340_v11, %v339_v10 }
 0x127   :  { %v275_v18 = vadd.f32 %v2134_v60, %v274_v16  ;;  %v353_v19 = vpack.c.bf16 %v338_v13, %v337_v12  ;;  %v1802_v20 = vpop.f32.mrb[6].mxu0  ;;  %v1910_v12 = vld [vmem:[#allocation6 + $0x20] sm:$0xff]  }
 0x128   :  { %v327_v23 = vmul.f32 0.1, %v283_v15  ;;  %v286_v24 = vadd.f32 %v1802_v20, %v2134_v60  ;;  %v277_v25 = vpop.f32.mrb[7].mxu0  ;;  %v2179_v13 = vld [vmem:[#allocation6 + $0xa0] sm:$0xff]  }
 0x129   :  { %v325_v28 = vmul.f32 0.1, %v275_v18  ;;  %608 = vmatmul.mubr.bf16.vlgmr.msra.gmra.mrb[0].mxu1 %v353_v19  ;;  %721 = vmatmul.mubr.bf16.vlgmr.msra.gmra.mrb[16].mxu0 %v353_v19  ;;  %v278_v29 = vadd.f32 %v2134_v60, %v277_v25  ;;  %v1914_v25 = vld [vmem:[#allocation6 + $0x28] sm:$0xff]  }
 0x12a   :  { %v343_v30 = vmax.f32 %v283_v15, %v327_v23  ;;  %v328_v31 = vmul.f32 0.1, %v286_v24  ;;  %617 = vmatprep.mubr.bf16.mxu1 %v1984_v1  ;;  %730 = vmatprep.mubr.bf16.mxu0 %v1984_v1 }
 0x12b   :  { %v341_v32 = vmax.f32 %v275_v18, %v325_v28  ;;  %v326_v33 = vmul.f32 0.1, %v278_v29  ;;  %1652 = vmatpush3.bf16.msra.mxu1 %v1899_v21  ;;  %1716 = vmatpush3.bf16.msra.mxu0 %v2142_v22  ;;  %v1918_v28 = vld [vmem:[#allocation6 + $0x70] sm:$0xff]  }
 0x12c   :  { %v344_v36 = vmax.f32 %v286_v24, %v328_v31  ;;  %1653 = vmatprep.subr.bf16.mxu1 %v1900_v26  ;;  %1717 = vmatprep.subr.bf16.mxu0 %v2145_v27 }
 0x12d   :  { %v342_v39 = vmax.f32 %v278_v29, %v326_v33  ;;  %v1805_v40 = vpop.f32.mrb[8].mxu0  ;;  %v2199_v33 = vld [vmem:[#allocation6 + $0xa8] sm:$0xff]  }
 0x12e   :  { %v299_v41 = vadd.f32 %v1805_v40, %v2134_v60  ;;  %v290_v42 = vpop.f32.mrb[9].mxu0  ;;  %v2157_v43 = vpack.c.bf16 %v344_v36, %v343_v30  ;;  %v2205_v36 = vld [vmem:[#allocation6 + $0xb0] sm:$0xff]   ;;  %v2211_v40 = vld [vmem:[#allocation6 + $0xb8] sm:$0xff]  }
 0x12f   :  { %v291_v44 = vadd.f32 %v2134_v60, %v290_v42  ;;  %v355_v45 = vpack.c.bf16 %v342_v39, %v341_v32  ;;  %v1806_v46 = vpop.f32.mrb[10].mxu0  ;;  %1654 = vmatpush3.bf16.msra.mxu1 %v1901_v34  ;;  %1718 = vmatpush3.bf16.msra.mxu0 %v2151_v35  ;;  %v2197_v32 = vld [vmem:[#allocation6 + $0xe8] sm:$0xff]   ;;  %v2203_v34 = vld [vmem:[#allocation6 + $0xf0] sm:$0xff]   ;;  %v1925_v39 = vld [vmem:[#allocation6 + $0x38] sm:$0xff]  }
 0x130   :  { %v331_v49 = vmul.f32 0.1, %v299_v41  ;;  %v302_v50 = vadd.f32 %v1806_v46, %v2134_v60  ;;  %v293_v51 = vpop.f32.mrb[11].mxu0  ;;  %1655 = vmatprep.subr.bf16.mxu1 %v1902_v37  ;;  %1719 = vmatprep.subr.bf16.mxu0 %v2154_v38  ;;  %v1924_v37 = vld [vmem:[#allocation6 + $0x78] sm:$0xff]  }
 0x131   :  { %618 = vmatmul.mubr.bf16.gmra.mrb[4].mxu1 %v354_v17  ;;  %731 = vmatmul.mubr.bf16.gmra.mrb[20].mxu0 %v354_v17  ;;  %v329_v54 = vmul.f32 0.1, %v291_v44  ;;  %v294_v55 = vadd.f32 %v2134_v60, %v293_v51  ;;  %v1912_v17 = vld [vmem:[#allocation6 + $0x68] sm:$0xff]  }
 0x132   :  { %v347_v56 = vmax.f32 %v299_v41, %v331_v49  ;;  %627 = vmatprep.mubr.bf16.mxu1 %v1984_v1  ;;  %740 = vmatprep.mubr.bf16.mxu0 %v1984_v1  ;;  %v332_v57 = vmul.f32 0.1, %v302_v50  ;;  %v395_v41 = vlaneseq }
 0x133   :  { %v345_v58 = vmax.f32 %v291_v44, %v329_v54  ;;  %v330_v61 = vmul.f32 0.1, %v294_v55  ;;  %1656 = vmatpush3.bf16.msra.mxu1 %v1903_v47  ;;  %1720 = vmatpush3.bf16.msra.mxu0 %v2161_v48 }
 0x134   :  { %v348_v0 = vmax.f32 %v302_v50, %v332_v57  ;;  %1657 = vmatprep.subr.bf16.mxu1 %v1904_v52  ;;  %1721 = vmatprep.subr.bf16.mxu0 %v2165_v53  ;;  %v396_v42 = vshrl.u32 %v395_v41, 7 }
 0x135   :  { %v346_v4 = vmax.f32 %v294_v55, %v330_v61  ;;  %v1809_v5 = vpop.f32.mrb[12].mxu0 }
 0x136   :  { %v315_v6 = vadd.f32 %v1809_v5, %v2134_v60  ;;  %v306_v7 = vpop.f32.mrb[13].mxu0  ;;  %v358_v8 = vpack.c.bf16 %v348_v0, %v347_v56  ;;  %v405_v44 = vsub.s32 2, %v396_v42  ;;  %v401_v46 = vsub.s32 1, %v396_v42 }
 0x137   :  { %v307_v9 = vadd.f32 %v2134_v60, %v306_v7  ;;  %v357_v10 = vpack.c.bf16 %v346_v4, %v345_v58  ;;  %v1810_v11 = vpop.f32.mrb[14].mxu0  ;;  %1658 = vmatpush3.bf16.msra.mxu1 %v1906_v62  ;;  %1722 = vmatpush3.bf16.msra.mxu0 %v2171_v63  ;;  %v409_v47 = vsub.s32 3, %v396_v42 }
 0x138   :  { %v335_v14 = vmul.f32 0.1, %v315_v6  ;;  %v318_v15 = vadd.f32 %v1810_v11, %v2134_v60  ;;  %v309_v16 = vpop.f32.mrb[15].mxu0  ;;  %1659 = vmatprep.subr.bf16.mxu1 %v1908_v2  ;;  %1723 = vmatprep.subr.bf16.mxu0 %v2174_v3 }
 0x139   :  { %628 = vmatmul.mubr.bf16.gmra.mrb[8].mxu1 %v355_v45  ;;  %741 = vmatmul.mubr.bf16.gmra.mrb[24].mxu0 %v355_v45  ;;  %v333_v18 = vmul.f32 0.1, %v307_v9  ;;  %v310_v19 = vadd.f32 %v2134_v60, %v309_v16  ;;  %v1919_v60 = vld [vmem:[#allocation6 + $0x30] sm:$0xff]   ;;  %v393_v45 = vld [vmem:[%s2416_s4] sm:$0xf] }
 0x13a   :  { %637 = vmatprep.mubr.bf16.mxu1 %v1984_v1  ;;  %750 = vmatprep.mubr.bf16.mxu0 %v1984_v1  ;;  %v351_v20 = vmax.f32 %v315_v6, %v335_v14  ;;  %v336_v21 = vmul.f32 0.1, %v318_v15  ;;  %v2221_v50 = vrot.slane %v393_v45, %v405_v44  ;;  %v2223_v51 = vrot.slane %v393_v45, %v401_v46 }
 0x13b   :  { %v349_v23 = vmax.f32 %v307_v9, %v333_v18  ;;  %v334_v24 = vmul.f32 0.1, %v310_v19  ;;  %1660 = vmatpush3.bf16.msra.mxu1 %v1910_v12  ;;  %1724 = vmatpush3.bf16.msra.mxu0 %v2179_v13  ;;  %v2225_v52 = vrot.slane %v393_v45, %v409_v47 }
 0x13c   :  { %v352_v26 = vmax.f32 %v318_v15, %v336_v21  ;;  %1661 = vmatprep.subr.bf16.mxu1 %v1912_v17  ;;  %1725 = vmatprep.subr.bf16.mxu0 %v2197_v32 }
 0x13d   :  { %v350_v29 = vmax.f32 %v310_v19, %v334_v24 }
 0x13e   :  { %v360_v30 = vpack.c.bf16 %v352_v26, %v351_v20 }
 0x13f   :  { %v359_v31 = vpack.c.bf16 %v350_v29, %v349_v23  ;;  %1662 = vmatpush3.bf16.msra.mxu1 %v1914_v25  ;;  %1726 = vmatpush3.bf16.msra.mxu0 %v2199_v33 }
 0x140   :  { %1663 = vmatprep.subr.bf16.mxu1 %v1918_v28  ;;  %1727 = vmatprep.subr.bf16.mxu0 %v2203_v34 }
 0x141   :  { %638 = vmatmul.mubr.bf16.gmra.mrb[12].mxu1 %v2157_v43  ;;  %751 = vmatmul.mubr.bf16.gmra.mrb[28].mxu0 %v2157_v43  ;;  %v397_v43 = vsub.s32 0, %v396_v42 }
 0x142   :  { %647 = vmatprep.mubr.bf16.mxu1 %v1984_v1  ;;  %760 = vmatprep.mubr.bf16.mxu0 %v1984_v1 }
 0x143   :  { %1664 = vmatpush3.bf16.msra.mxu1 %v1919_v60  ;;  %1728 = vmatpush3.bf16.msra.mxu0 %v2205_v36  ;;  %v2219_v49 = vrot.slane %v393_v45, %v397_v43 }
 0x144   :  { %1665 = vmatprep.subr.bf16.mxu1 %v1924_v37 }
 0x147   :  { %1666 = vmatpush3.bf16.msra.mxu1 %v1925_v39 }
 0x148   :  { %1811 = vmatprep.subr.bf16.mxu1 %v2128_v59 }
 0x149   :  { %648 = vmatmul.mubr.bf16.gmra.mrb[16].mxu1 %v357_v10  ;;  %761 = vmatmul.mubr.bf16.gmra.mrb[32].mxu0 %v357_v10 }
 0x14a   :  { %657 = vmatprep.mubr.bf16.mxu1 %v1984_v1  ;;  %770 = vmatprep.mubr.bf16.mxu0 %v1984_v1 }
 0x151   :  { %658 = vmatmul.mubr.bf16.gmra.mrb[20].mxu1 %v358_v8  ;;  %771 = vmatmul.mubr.bf16.gmra.mrb[36].mxu0 %v358_v8 }
 0x152   :  { %667 = vmatprep.mubr.bf16.mxu1 %v1984_v1  ;;  %780 = vmatprep.mubr.bf16.mxu0 %v1984_v1 }
 0x159   :  { %668 = vmatmul.mubr.bf16.gmra.mrb[24].mxu1 %v359_v31  ;;  %781 = vmatmul.mubr.bf16.gmra.mrb[40].mxu0 %v359_v31 }
 0x15a   :  { %677 = vmatprep.mubr.bf16.mxu1 %v1984_v1  ;;  %790 = vmatprep.mubr.bf16.mxu0 %v1984_v1  ;;  %v2209_v1 = vld [vmem:[#allocation6 + $0xf8] sm:$0xff]  }
 0x15b   :  { %1729 = vmatprep.subr.bf16.mxu0 %v2209_v1 }
 0x15c   :  { %1730 = vmatpush3.bf16.msra.mxu0 %v2211_v40 }
 0x161   :  { %678 = vmatmul.mubr.bf16.gmra.mrb[28].mxu1 %v360_v30  ;;  %791 = vmatmul.mubr.bf16.gmra.mrb[44].mxu0 %v360_v30 }
 0x1fc   :  { %v609_v54 = vpop.f32.mrb[0].mxu1  ;;  %v722_v59 = vpop.f32.mrb[16].mxu0 }
 0x1fd   :  { %v610_v55 = vadd.f32 %v609_v54, %v2219_v49  ;;  %v723_v56 = vadd.f32 %v722_v59, %v2221_v50  ;;  %v611_v57 = vpop.f32.mrb[1].mxu1  ;;  %v724_v58 = vpop.f32.mrb[17].mxu0 }
 0x1fe   :  { %v612_v61 = vadd.f32 %v611_v57, %v2223_v51  ;;  %v725_v62 = vadd.f32 %v724_v58, %v2225_v52  ;;  %v613_v0 = vpop.f32.mrb[2].mxu1  ;;  %v726_v2 = vpop.f32.mrb[18].mxu0 }
 0x1ff   :  { %v801_v4 = vmul.f32 0.1, %v610_v55  ;;  %v803_v5 = vmul.f32 0.1, %v723_v56  ;;  %v614_v6 = vadd.f32 %v613_v0, %v2219_v49  ;;  %v727_v7 = vadd.f32 %v726_v2, %v2221_v50  ;;  %v615_v8 = vpop.f32.mrb[3].mxu1  ;;  %v728_v9 = vpop.f32.mrb[19].mxu0 }
 0x200   :  { %v802_v10 = vmul.f32 0.1, %v612_v61  ;;  %v804_v11 = vmul.f32 0.1, %v725_v62  ;;  %v616_v12 = vadd.f32 %v615_v8, %v2223_v51  ;;  %v729_v14 = vadd.f32 %v728_v9, %v2225_v52 }
 0x201   :  { %v805_v15 = vmul.f32 0.1, %v614_v6  ;;  %v807_v16 = vmul.f32 0.1, %v727_v7  ;;  %v865_v19 = vmax.f32 %v610_v55, %v801_v4  ;;  %v867_v20 = vmax.f32 %v723_v56, %v803_v5 }
 0x202   :  { %v806_v17 = vmul.f32 0.1, %v616_v12  ;;  %v808_v18 = vmul.f32 0.1, %v729_v14  ;;  %v866_v24 = vmax.f32 %v612_v61, %v802_v10  ;;  %v868_v25 = vmax.f32 %v725_v62, %v804_v11 }
 0x203   :  { %v869_v21 = vmax.f32 %v614_v6, %v805_v15  ;;  %v871_v23 = vmax.f32 %v727_v7, %v807_v16 }
 0x204   :  { %v870_v26 = vmax.f32 %v616_v12, %v806_v17  ;;  %v872_v28 = vmax.f32 %v729_v14, %v808_v18  ;;  %v619_v29 = vpop.f32.mrb[4].mxu1  ;;  %v732_v30 = vpop.f32.mrb[20].mxu0 }
 0x205   :  { %v929_v31 = vpack.c.bf16 %v869_v21, %v865_v19  ;;  %v931_v60 = vpack.c.bf16 %v871_v23, %v867_v20  ;;  %v620_v37 = vadd.f32 %v619_v29, %v2219_v49  ;;  %v733_v39 = vadd.f32 %v732_v30, %v2221_v50  ;;  %v621_v41 = vpop.f32.mrb[5].mxu1  ;;  %v734_v42 = vpop.f32.mrb[21].mxu0 }
 0x206   :  { %v622_v43 = vadd.f32 %v621_v41, %v2223_v51  ;;  %v735_v44 = vadd.f32 %v734_v42, %v2225_v52  ;;  %v623_v45 = vpop.f32.mrb[6].mxu1  ;;  %v736_v46 = vpop.f32.mrb[22].mxu0  ;;  %v930_v47 = vpack.c.bf16 %v870_v26, %v866_v24  ;;  %v932_v54 = vpack.c.bf16 %v872_v28, %v868_v25 }
 0x207   :  { %v809_v59 = vmul.f32 0.1, %v620_v37  ;;  %v811_v55 = vmul.f32 0.1, %v733_v39  ;;  %v624_v56 = vadd.f32 %v623_v45, %v2219_v49  ;;  %v737_v57 = vadd.f32 %v736_v46, %v2221_v50  ;;  %v625_v58 = vpop.f32.mrb[7].mxu1  ;;  %v738_v61 = vpop.f32.mrb[23].mxu0 }
 0x208   :  { %v810_v62 = vmul.f32 0.1, %v622_v43  ;;  %v812_v0 = vmul.f32 0.1, %v735_v44  ;;  %v626_v2 = vadd.f32 %v625_v58, %v2223_v51  ;;  %v739_v4 = vadd.f32 %v738_v61, %v2225_v52  ;;  %1256 = vmatprep.mubr.bf16.mxu1 %v930_v47  ;;  %1353 = vmatprep.mubr.bf16.mxu0 %v932_v54 }
 0x209   :  { %v813_v5 = vmul.f32 0.1, %v624_v56  ;;  %v815_v6 = vmul.f32 0.1, %v737_v57  ;;  %1257 = vmatmul.mubr.bf16.vlgmr.msra.gmra.mrb[32].mxu1 %v929_v31  ;;  %1354 = vmatmul.mubr.bf16.vlgmr.msra.gmra.mrb[48].mxu0 %v931_v60  ;;  %v873_v9 = vmax.f32 %v620_v37, %v809_v59  ;;  %v875_v10 = vmax.f32 %v733_v39, %v811_v55 }
 0x20a   :  { %v814_v7 = vmul.f32 0.1, %v626_v2  ;;  %v816_v8 = vmul.f32 0.1, %v739_v4  ;;  %1819 = vmatpush3.bf16.msra.mxu1 %v2142_v22  ;;  %v874_v14 = vmax.f32 %v622_v43, %v810_v62  ;;  %v876_v15 = vmax.f32 %v735_v44, %v812_v0 }
 0x20b   :  { %v877_v11 = vmax.f32 %v624_v56, %v813_v5  ;;  %v879_v12 = vmax.f32 %v737_v57, %v815_v6  ;;  %1812 = vmatprep.subr.bf16.mxu1 %v2145_v27 }
 0x20c   :  { %v878_v16 = vmax.f32 %v626_v2, %v814_v7  ;;  %v880_v17 = vmax.f32 %v739_v4, %v816_v8  ;;  %v629_v18 = vpop.f32.mrb[8].mxu1  ;;  %v742_v19 = vpop.f32.mrb[24].mxu0 }
 0x20d   :  { %v630_v20 = vadd.f32 %v629_v18, %v2219_v49  ;;  %v743_v21 = vadd.f32 %v742_v19, %v2221_v50  ;;  %v631_v23 = vpop.f32.mrb[9].mxu1  ;;  %v744_v24 = vpop.f32.mrb[25].mxu0  ;;  %v933_v25 = vpack.c.bf16 %v877_v11, %v873_v9  ;;  %v935_v22 = vpack.c.bf16 %v879_v12, %v875_v10 }
 0x20e   :  { %v632_v26 = vadd.f32 %v631_v23, %v2223_v51  ;;  %v745_v28 = vadd.f32 %v744_v24, %v2225_v52  ;;  %v633_v29 = vpop.f32.mrb[10].mxu1  ;;  %v746_v27 = vpop.f32.mrb[26].mxu0  ;;  %v934_v30 = vpack.c.bf16 %v878_v16, %v874_v14  ;;  %v936_v31 = vpack.c.bf16 %v880_v17, %v876_v15  ;;  %1820 = vmatpush3.bf16.msra.mxu1 %v2151_v35 }
 0x20f   :  { %v817_v60 = vmul.f32 0.1, %v630_v20  ;;  %v819_v37 = vmul.f32 0.1, %v743_v21  ;;  %v634_v39 = vadd.f32 %v633_v29, %v2219_v49  ;;  %v747_v41 = vadd.f32 %v746_v27, %v2221_v50  ;;  %v635_v42 = vpop.f32.mrb[11].mxu1  ;;  %v748_v43 = vpop.f32.mrb[27].mxu0  ;;  %1813 = vmatprep.subr.bf16.mxu1 %v2154_v38 }
 0x210   :  { %v818_v44 = vmul.f32 0.1, %v632_v26  ;;  %v820_v45 = vmul.f32 0.1, %v745_v28  ;;  %v636_v46 = vadd.f32 %v635_v42, %v2223_v51  ;;  %v749_v47 = vadd.f32 %v748_v43, %v2225_v52  ;;  %1264 = vmatprep.mubr.bf16.mxu1 %v934_v30  ;;  %1361 = vmatprep.mubr.bf16.mxu0 %v936_v31 }
 0x211   :  { %v821_v54 = vmul.f32 0.1, %v634_v39  ;;  %v823_v35 = vmul.f32 0.1, %v747_v41  ;;  %1265 = vmatmul.mubr.bf16.gmra.mrb[36].mxu1 %v933_v25  ;;  %1362 = vmatmul.mubr.bf16.gmra.mrb[52].mxu0 %v935_v22  ;;  %v881_v56 = vmax.f32 %v630_v20, %v817_v60  ;;  %v883_v57 = vmax.f32 %v743_v21, %v819_v37 }
 0x212   :  { %v822_v59 = vmul.f32 0.1, %v636_v46  ;;  %v824_v55 = vmul.f32 0.1, %v749_v47  ;;  %1821 = vmatpush3.bf16.msra.mxu1 %v2161_v48  ;;  %v882_v61 = vmax.f32 %v632_v26, %v818_v44  ;;  %v884_v62 = vmax.f32 %v745_v28, %v820_v45 }
 0x213   :  { %v885_v58 = vmax.f32 %v634_v39, %v821_v54  ;;  %v887_v38 = vmax.f32 %v747_v41, %v823_v35  ;;  %1814 = vmatprep.subr.bf16.mxu1 %v2165_v53 }
 0x214   :  { %v886_v0 = vmax.f32 %v636_v46, %v822_v59  ;;  %v888_v2 = vmax.f32 %v749_v47, %v824_v55  ;;  %v639_v4 = vpop.f32.mrb[12].mxu1  ;;  %v752_v5 = vpop.f32.mrb[28].mxu0 }
 0x215   :  { %v640_v6 = vadd.f32 %v639_v4, %v2219_v49  ;;  %v753_v7 = vadd.f32 %v752_v5, %v2221_v50  ;;  %v641_v8 = vpop.f32.mrb[13].mxu1  ;;  %v754_v9 = vpop.f32.mrb[29].mxu0  ;;  %v937_v10 = vpack.c.bf16 %v885_v58, %v881_v56  ;;  %v939_v48 = vpack.c.bf16 %v887_v38, %v883_v57 }
 0x216   :  { %v642_v11 = vadd.f32 %v641_v8, %v2223_v51  ;;  %v755_v12 = vadd.f32 %v754_v9, %v2225_v52  ;;  %v643_v14 = vpop.f32.mrb[14].mxu1  ;;  %v756_v53 = vpop.f32.mrb[30].mxu0  ;;  %v938_v15 = vpack.c.bf16 %v886_v0, %v882_v61  ;;  %v940_v16 = vpack.c.bf16 %v888_v2, %v884_v62  ;;  %1822 = vmatpush3.bf16.msra.mxu1 %v2171_v63 }
 0x217   :  { %v825_v17 = vmul.f32 0.1, %v640_v6  ;;  %v827_v18 = vmul.f32 0.1, %v753_v7  ;;  %v644_v19 = vadd.f32 %v643_v14, %v2219_v49  ;;  %v757_v20 = vadd.f32 %v756_v53, %v2221_v50  ;;  %v645_v21 = vpop.f32.mrb[15].mxu1  ;;  %v758_v23 = vpop.f32.mrb[31].mxu0  ;;  %1815 = vmatprep.subr.bf16.mxu1 %v2174_v3 }
 0x218   :  { %v826_v24 = vmul.f32 0.1, %v642_v11  ;;  %v828_v25 = vmul.f32 0.1, %v755_v12  ;;  %v646_v22 = vadd.f32 %v645_v21, %v2223_v51  ;;  %v759_v26 = vadd.f32 %v758_v23, %v2225_v52  ;;  %1272 = vmatprep.mubr.bf16.mxu1 %v938_v15  ;;  %1369 = vmatprep.mubr.bf16.mxu0 %v940_v16 }
 0x219   :  { %v829_v28 = vmul.f32 0.1, %v644_v19  ;;  %v831_v63 = vmul.f32 0.1, %v757_v20  ;;  %1273 = vmatmul.mubr.bf16.gmra.mrb[40].mxu1 %v937_v10  ;;  %1370 = vmatmul.mubr.bf16.gmra.mrb[56].mxu0 %v939_v48  ;;  %v889_v30 = vmax.f32 %v640_v6, %v825_v17  ;;  %v891_v31 = vmax.f32 %v753_v7, %v827_v18 }
 0x21a   :  { %v830_v29 = vmul.f32 0.1, %v646_v22  ;;  %v832_v27 = vmul.f32 0.1, %v759_v26  ;;  %1823 = vmatpush3.bf16.msra.mxu1 %v2179_v13  ;;  %v890_v37 = vmax.f32 %v642_v11, %v826_v24  ;;  %v892_v39 = vmax.f32 %v755_v12, %v828_v25 }
 0x21b   :  { %v893_v60 = vmax.f32 %v644_v19, %v829_v28  ;;  %v895_v3 = vmax.f32 %v757_v20, %v831_v63  ;;  %1816 = vmatprep.subr.bf16.mxu1 %v2197_v32 }
 0x21c   :  { %v894_v41 = vmax.f32 %v646_v22, %v830_v29  ;;  %v896_v42 = vmax.f32 %v759_v26, %v832_v27  ;;  %v649_v43 = vpop.f32.mrb[16].mxu1  ;;  %v762_v44 = vpop.f32.mrb[32].mxu0 }
 0x21d   :  { %v650_v45 = vadd.f32 %v649_v43, %v2219_v49  ;;  %v763_v46 = vadd.f32 %v762_v44, %v2221_v50  ;;  %v651_v47 = vpop.f32.mrb[17].mxu1  ;;  %v764_v54 = vpop.f32.mrb[33].mxu0  ;;  %v941_v35 = vpack.c.bf16 %v893_v60, %v889_v30  ;;  %v943_v13 = vpack.c.bf16 %v895_v3, %v891_v31 }
 0x21e   :  { %v652_v59 = vadd.f32 %v651_v47, %v2223_v51  ;;  %v765_v55 = vadd.f32 %v764_v54, %v2225_v52  ;;  %v653_v56 = vpop.f32.mrb[18].mxu1  ;;  %v766_v32 = vpop.f32.mrb[34].mxu0  ;;  %v942_v57 = vpack.c.bf16 %v894_v41, %v890_v37  ;;  %v944_v58 = vpack.c.bf16 %v896_v42, %v892_v39  ;;  %1824 = vmatpush3.bf16.msra.mxu1 %v2199_v33 }
 0x21f   :  { %v833_v38 = vmul.f32 0.1, %v650_v45  ;;  %v835_v61 = vmul.f32 0.1, %v763_v46  ;;  %v654_v62 = vadd.f32 %v653_v56, %v2219_v49  ;;  %v767_v0 = vadd.f32 %v766_v32, %v2221_v50  ;;  %v655_v2 = vpop.f32.mrb[19].mxu1  ;;  %v768_v4 = vpop.f32.mrb[35].mxu0  ;;  %1817 = vmatprep.subr.bf16.mxu1 %v2203_v34 }
 0x220   :  { %v834_v5 = vmul.f32 0.1, %v652_v59  ;;  %v836_v6 = vmul.f32 0.1, %v765_v55  ;;  %v656_v7 = vadd.f32 %v655_v2, %v2223_v51  ;;  %v769_v8 = vadd.f32 %v768_v4, %v2225_v52  ;;  %1280 = vmatprep.mubr.bf16.mxu1 %v942_v57  ;;  %1377 = vmatprep.mubr.bf16.mxu0 %v944_v58 }
 0x221   :  { %v837_v9 = vmul.f32 0.1, %v654_v62  ;;  %v839_v33 = vmul.f32 0.1, %v767_v0  ;;  %1281 = vmatmul.mubr.bf16.gmra.mrb[44].mxu1 %v941_v35  ;;  %1378 = vmatmul.mubr.bf16.gmra.mrb[60].mxu0 %v943_v13  ;;  %v897_v11 = vmax.f32 %v650_v45, %v833_v38  ;;  %v899_v12 = vmax.f32 %v763_v46, %v835_v61 }
 0x222   :  { %v838_v10 = vmul.f32 0.1, %v656_v7  ;;  %v840_v48 = vmul.f32 0.1, %v769_v8  ;;  %1825 = vmatpush3.bf16.msra.mxu1 %v2205_v36  ;;  %v898_v53 = vmax.f32 %v652_v59, %v834_v5  ;;  %v900_v15 = vmax.f32 %v765_v55, %v836_v6 }
 0x223   :  { %v901_v14 = vmax.f32 %v654_v62, %v837_v9  ;;  %v903_v34 = vmax.f32 %v767_v0, %v839_v33  ;;  %1818 = vmatprep.subr.bf16.mxu1 %v2209_v1 }
 0x224   :  { %v902_v16 = vmax.f32 %v656_v7, %v838_v10  ;;  %v904_v17 = vmax.f32 %v769_v8, %v840_v48  ;;  %v659_v18 = vpop.f32.mrb[20].mxu1  ;;  %v772_v19 = vpop.f32.mrb[36].mxu0 }
 0x225   :  { %v660_v20 = vadd.f32 %v659_v18, %v2219_v49  ;;  %v773_v21 = vadd.f32 %v772_v19, %v2221_v50  ;;  %v661_v23 = vpop.f32.mrb[21].mxu1  ;;  %v774_v24 = vpop.f32.mrb[37].mxu0  ;;  %v945_v25 = vpack.c.bf16 %v901_v14, %v897_v11  ;;  %v947_v36 = vpack.c.bf16 %v903_v34, %v899_v12 }
 0x226   :  { %v662_v22 = vadd.f32 %v661_v23, %v2223_v51  ;;  %v775_v26 = vadd.f32 %v774_v24, %v2225_v52  ;;  %v663_v28 = vpop.f32.mrb[22].mxu1  ;;  %v776_v1 = vpop.f32.mrb[38].mxu0  ;;  %v946_v63 = vpack.c.bf16 %v902_v16, %v898_v53  ;;  %v948_v29 = vpack.c.bf16 %v904_v17, %v900_v15  ;;  %1826 = vmatpush3.bf16.msra.mxu1 %v2211_v40 }
 0x227   :  { %v841_v27 = vmul.f32 0.1, %v660_v20  ;;  %v843_v30 = vmul.f32 0.1, %v773_v21  ;;  %v664_v31 = vadd.f32 %v663_v28, %v2219_v49  ;;  %v777_v60 = vadd.f32 %v776_v1, %v2221_v50  ;;  %v665_v3 = vpop.f32.mrb[23].mxu1  ;;  %v778_v37 = vpop.f32.mrb[39].mxu0 }
 0x228   :  { %v842_v39 = vmul.f32 0.1, %v662_v22  ;;  %v844_v41 = vmul.f32 0.1, %v775_v26  ;;  %v666_v42 = vadd.f32 %v665_v3, %v2223_v51  ;;  %v779_v43 = vadd.f32 %v778_v37, %v2225_v52  ;;  %1288 = vmatprep.mubr.bf16.mxu1 %v946_v63  ;;  %1385 = vmatprep.mubr.bf16.mxu0 %v948_v29 }
 0x229   :  { %v845_v44 = vmul.f32 0.1, %v664_v31  ;;  %v847_v45 = vmul.f32 0.1, %v777_v60  ;;  %1289 = vmatmul.mubr.bf16.gmra.mrb[48].mxu1 %v945_v25  ;;  %1386 = vmatmul.mubr.bf16.gmra.mrb[64].mxu0 %v947_v36  ;;  %v905_v47 = vmax.f32 %v660_v20, %v841_v27  ;;  %v907_v54 = vmax.f32 %v773_v21, %v843_v30 }
 0x22a   :  { %v846_v40 = vmul.f32 0.1, %v666_v42  ;;  %v848_v46 = vmul.f32 0.1, %v779_v43  ;;  %v906_v59 = vmax.f32 %v662_v22, %v842_v39  ;;  %v908_v55 = vmax.f32 %v775_v26, %v844_v41 }
 0x22b   :  { %v909_v35 = vmax.f32 %v664_v31, %v845_v44  ;;  %v911_v13 = vmax.f32 %v777_v60, %v847_v45 }
 0x22c   :  { %v910_v56 = vmax.f32 %v666_v42, %v846_v40  ;;  %v912_v32 = vmax.f32 %v779_v43, %v848_v46  ;;  %v669_v57 = vpop.f32.mrb[24].mxu1  ;;  %v782_v58 = vpop.f32.mrb[40].mxu0 }
 0x22d   :  { %v670_v38 = vadd.f32 %v669_v57, %v2219_v49  ;;  %v783_v61 = vadd.f32 %v782_v58, %v2221_v50  ;;  %v671_v62 = vpop.f32.mrb[25].mxu1  ;;  %v784_v0 = vpop.f32.mrb[41].mxu0  ;;  %v949_v2 = vpack.c.bf16 %v909_v35, %v905_v47  ;;  %v951_v4 = vpack.c.bf16 %v911_v13, %v907_v54 }
 0x22e   :  { %v672_v5 = vadd.f32 %v671_v62, %v2223_v51  ;;  %v785_v6 = vadd.f32 %v784_v0, %v2225_v52  ;;  %v673_v7 = vpop.f32.mrb[26].mxu1  ;;  %v786_v8 = vpop.f32.mrb[42].mxu0  ;;  %v950_v9 = vpack.c.bf16 %v910_v56, %v906_v59  ;;  %v952_v33 = vpack.c.bf16 %v912_v32, %v908_v55 }
 0x22f   :  { %v849_v10 = vmul.f32 0.1, %v670_v38  ;;  %v851_v48 = vmul.f32 0.1, %v783_v61  ;;  %v674_v11 = vadd.f32 %v673_v7, %v2219_v49  ;;  %v787_v12 = vadd.f32 %v786_v8, %v2221_v50  ;;  %v675_v14 = vpop.f32.mrb[27].mxu1  ;;  %v788_v34 = vpop.f32.mrb[43].mxu0 }
 0x230   :  { %v850_v53 = vmul.f32 0.1, %v672_v5  ;;  %v852_v15 = vmul.f32 0.1, %v785_v6  ;;  %v676_v16 = vadd.f32 %v675_v14, %v2223_v51  ;;  %v789_v17 = vadd.f32 %v788_v34, %v2225_v52  ;;  %1296 = vmatprep.mubr.bf16.mxu1 %v950_v9  ;;  %1393 = vmatprep.mubr.bf16.mxu0 %v952_v33 }
 0x231   :  { %v853_v18 = vmul.f32 0.1, %v674_v11  ;;  %v855_v19 = vmul.f32 0.1, %v787_v12  ;;  %1297 = vmatmul.mubr.bf16.gmra.mrb[52].mxu1 %v949_v2  ;;  %1394 = vmatmul.mubr.bf16.gmra.mrb[68].mxu0 %v951_v4  ;;  %v913_v23 = vmax.f32 %v670_v38, %v849_v10  ;;  %v915_v24 = vmax.f32 %v783_v61, %v851_v48  ;;  %v2309_v10 = vld [vmem:[%s2418_s6] ss:$0 sm:$0xff] }
 0x232   :  { %v854_v20 = vmul.f32 0.1, %v676_v16  ;;  %v856_v21 = vmul.f32 0.1, %v789_v17  ;;  %v914_v22 = vmax.f32 %v672_v5, %v850_v53  ;;  %v916_v26 = vmax.f32 %v785_v6, %v852_v15 }
 0x233   :  { %v917_v25 = vmax.f32 %v674_v11, %v853_v18  ;;  %v919_v36 = vmax.f32 %v787_v12, %v855_v19 }
 0x234   :  { %v918_v28 = vmax.f32 %v676_v16, %v854_v20  ;;  %v920_v1 = vmax.f32 %v789_v17, %v856_v21  ;;  %v679_v63 = vpop.f32.mrb[28].mxu1  ;;  %v792_v29 = vpop.f32.mrb[44].mxu0 }
 0x235   :  { %v955_v27 = vpack.c.bf16 %v919_v36, %v915_v24  ;;  %v680_v30 = vadd.f32 %v679_v63, %v2219_v49  ;;  %v793_v31 = vadd.f32 %v792_v29, %v2221_v50  ;;  %v681_v60 = vpop.f32.mrb[29].mxu1  ;;  %v794_v3 = vpop.f32.mrb[45].mxu0  ;;  %v953_v37 = vpack.c.bf16 %v917_v25, %v913_v23 }
 0x236   :  { %v682_v39 = vadd.f32 %v681_v60, %v2223_v51  ;;  %v795_v41 = vadd.f32 %v794_v3, %v2225_v52  ;;  %v683_v42 = vpop.f32.mrb[30].mxu1  ;;  %v796_v43 = vpop.f32.mrb[46].mxu0  ;;  %v954_v44 = vpack.c.bf16 %v918_v28, %v914_v22  ;;  %v956_v45 = vpack.c.bf16 %v920_v1, %v916_v26  ;;  %v2316_v28 = vld [vmem:[%s2419_s7] ss:$0 sm:$0xff] }
 0x237   :  { %v857_v40 = vmul.f32 0.1, %v680_v30  ;;  %v859_v46 = vmul.f32 0.1, %v793_v31  ;;  %v684_v47 = vadd.f32 %v683_v42, %v2219_v49  ;;  %v797_v54 = vadd.f32 %v796_v43, %v2221_v50  ;;  %v685_v35 = vpop.f32.mrb[31].mxu1  ;;  %v798_v13 = vpop.f32.mrb[47].mxu0 }
 0x238   :  { %v858_v59 = vmul.f32 0.1, %v682_v39  ;;  %v860_v55 = vmul.f32 0.1, %v795_v41  ;;  %v686_v56 = vadd.f32 %v685_v35, %v2223_v51  ;;  %v799_v32 = vadd.f32 %v798_v13, %v2225_v52  ;;  %1304 = vmatprep.mubr.bf16.mxu1 %v954_v44 }
 0x239   :  { %v861_v57 = vmul.f32 0.1, %v684_v47  ;;  %v863_v58 = vmul.f32 0.1, %v797_v54  ;;  %1305 = vmatmul.mubr.bf16.gmra.mrb[56].mxu1 %v953_v37  ;;  %v921_v62 = vmax.f32 %v680_v30, %v857_v40  ;;  %v923_v0 = vmax.f32 %v793_v31, %v859_v46 }
 0x23a   :  { %v862_v38 = vmul.f32 0.1, %v686_v56  ;;  %v864_v61 = vmul.f32 0.1, %v799_v32  ;;  %v922_v4 = vmax.f32 %v682_v39, %v858_v59  ;;  %v924_v50 = vmax.f32 %v795_v41, %v860_v55 }
 0x23b   :  { %v925_v2 = vmax.f32 %v684_v47, %v861_v57  ;;  %v927_v49 = vmax.f32 %v797_v54, %v863_v58 }
 0x23c   :  { %v926_v5 = vmax.f32 %v686_v56, %v862_v38  ;;  %v928_v6 = vmax.f32 %v799_v32, %v864_v61 }
 0x23d   :  { %v957_v7 = vpack.c.bf16 %v925_v2, %v921_v62  ;;  %v959_v8 = vpack.c.bf16 %v927_v49, %v923_v0 }
 0x23e   :  { %v958_v9 = vpack.c.bf16 %v926_v5, %v922_v4  ;;  %v960_v51 = vpack.c.bf16 %v928_v6, %v924_v50 }
 0x240   :  { %1312 = vmatprep.mubr.bf16.mxu1 %v958_v9 }
 0x241   :  { %1313 = vmatmul.mubr.bf16.gmra.mrb[60].mxu1 %v957_v7 }
 0x242   :  { %1401 = vmatprep.mubr.bf16.mxu1 %v956_v45 }
 0x249   :  { %1402 = vmatmul.mubr.bf16.vlgmr.msra.gmra.mrb[64].mxu1 %v955_v27 }
 0x24a   :  { %1409 = vmatprep.mubr.bf16.mxu1 %v960_v51 }
 0x251   :  { %1410 = vmatmul.mubr.bf16.gmra.mrb[68].mxu1 %v959_v8 }
 0x2dc   :  { %v1667_v52 = vpop.f32.mrb[32].mxu1  ;;  %v1731_v33 = vpop.f32.mrb[48].mxu0 }
 0x2dd   :  { %v1668_v48 = vpop.f32.mrb[33].mxu1  ;;  %v1732_v11 = vpop.f32.mrb[49].mxu0 }
 0x2de   :  { %v1669_v12 = vadd.f32 %v1668_v48, %v1667_v52  ;;  %v1733_v14 = vadd.f32 %v1732_v11, %v1731_v33  ;;  %v1670_v34 = vpop.f32.mrb[34].mxu1  ;;  %v1734_v53 = vpop.f32.mrb[50].mxu0 }
 0x2df   :  { %v1671_v15 = vpop.f32.mrb[35].mxu1  ;;  %v1735_v16 = vpop.f32.mrb[51].mxu0 }
 0x2e0   :  { %v1259_v17 = vadd.f32 %v1669_v12, %v2309_v10  ;;  %v1672_v18 = vadd.f32 %v1671_v15, %v1670_v34  ;;  %v1736_v19 = vadd.f32 %v1735_v16, %v1734_v53 }
 0x2e2   :  { %v1356_v20 = vadd.f32 %v1733_v14, %v1259_v17  ;;  %v1262_v21 = vadd.f32 %v1672_v18, %v2309_v10 }
 0x2e4   :  { %v1359_v23 = vadd.f32 %v1736_v19, %v1262_v21  ;;  %v1673_v24 = vpop.f32.mrb[36].mxu1  ;;  %v1737_v25 = vpop.f32.mrb[52].mxu0  ;;  %v1418_v36 = vmul.f32 0.1, %v1356_v20 }
 0x2e5   :  { %v1674_v22 = vpop.f32.mrb[37].mxu1  ;;  %v1738_v26 = vpop.f32.mrb[53].mxu0 }
 0x2e6   :  { %v1419_v1 = vmul.f32 0.1, %v1359_v23  ;;  %v1675_v63 = vadd.f32 %v1674_v22, %v1673_v24  ;;  %v1739_v29 = vadd.f32 %v1738_v26, %v1737_v25  ;;  %v1676_v27 = vpop.f32.mrb[38].mxu1  ;;  %v1740_v30 = vpop.f32.mrb[54].mxu0  ;;  %v1434_v31 = vmax.f32 %v1356_v20, %v1418_v36 }
 0x2e7   :  { %v1677_v60 = vpop.f32.mrb[39].mxu1  ;;  %v1741_v3 = vpop.f32.mrb[55].mxu0 }
 0x2e8   :  { %v1267_v37 = vadd.f32 %v1675_v63, %v2309_v10  ;;  %v1678_v39 = vadd.f32 %v1677_v60, %v1676_v27  ;;  %v1742_v41 = vadd.f32 %v1741_v3, %v1740_v30  ;;  %v1457_v42 = vmul.f32 %v2316_v28, %v1434_v31 }
 0x2e9   :  { %v1435_v43 = vmax.f32 %v1359_v23, %v1419_v1 }
 0x2ea   :  { %v1364_v44 = vadd.f32 %v1739_v29, %v1267_v37  ;;  %v1270_v45 = vadd.f32 %v1678_v39, %v2309_v10  ;;  %1473 = vadd.xlane.f32.xlu0 %v1457_v42 }
 0x2eb   :  { %v1458_v54 = vmul.f32 %v2316_v28, %v1435_v43 }
 0x2ec   :  { %v1367_v40 = vadd.f32 %v1742_v41, %v1270_v45  ;;  %v1679_v46 = vpop.f32.mrb[40].mxu1  ;;  %v1743_v47 = vpop.f32.mrb[56].mxu0  ;;  %v1420_v35 = vmul.f32 0.1, %v1364_v44 }
 0x2ed   :  { %v1680_v13 = vpop.f32.mrb[41].mxu1  ;;  %v1744_v59 = vpop.f32.mrb[57].mxu0 }
 0x2ee   :  { %v1421_v55 = vmul.f32 0.1, %v1367_v40  ;;  %v1681_v56 = vadd.f32 %v1680_v13, %v1679_v46  ;;  %v1745_v32 = vadd.f32 %v1744_v59, %v1743_v47  ;;  %v1682_v57 = vpop.f32.mrb[42].mxu1  ;;  %v1746_v58 = vpop.f32.mrb[58].mxu0  ;;  %1475 = vadd.xlane.f32.xlu0 %v1458_v54  ;;  %v1436_v38 = vmax.f32 %v1364_v44, %v1420_v35 }
 0x2ef   :  { %v1683_v61 = vpop.f32.mrb[43].mxu1  ;;  %v1747_v62 = vpop.f32.mrb[59].mxu0 }
 0x2f0   :  { %v1275_v0 = vadd.f32 %v1681_v56, %v2309_v10  ;;  %v1684_v2 = vadd.f32 %v1683_v61, %v1682_v57  ;;  %v1748_v49 = vadd.f32 %v1747_v62, %v1746_v58  ;;  %v1459_v4 = vmul.f32 %v2316_v28, %v1436_v38 }
 0x2f1   :  { %v1437_v50 = vmax.f32 %v1367_v40, %v1421_v55 }
 0x2f2   :  { %v1372_v5 = vadd.f32 %v1745_v32, %v1275_v0  ;;  %v1278_v6 = vadd.f32 %v1684_v2, %v2309_v10  ;;  %1477 = vadd.xlane.f32.xlu1 %v1459_v4 }
 0x2f3   :  { %v1460_v52 = vmul.f32 %v2316_v28, %v1437_v50 }
 0x2f4   :  { %v1422_v7 = vmul.f32 0.1, %v1372_v5  ;;  %v1375_v8 = vadd.f32 %v1748_v49, %v1278_v6  ;;  %v1685_v9 = vpop.f32.mrb[44].mxu1  ;;  %v1749_v51 = vpop.f32.mrb[60].mxu0 }
 0x2f5   :  { %v1686_v33 = vpop.f32.mrb[45].mxu1  ;;  %v1750_v48 = vpop.f32.mrb[61].mxu0 }
 0x2f6   :  { %v1423_v11 = vmul.f32 0.1, %v1375_v8  ;;  %v1687_v12 = vadd.f32 %v1686_v33, %v1685_v9  ;;  %v1751_v14 = vadd.f32 %v1750_v48, %v1749_v51  ;;  %v1688_v34 = vpop.f32.mrb[46].mxu1  ;;  %v1752_v53 = vpop.f32.mrb[62].mxu0  ;;  %1479 = vadd.xlane.f32.xlu1 %v1460_v52  ;;  %v1438_v15 = vmax.f32 %v1372_v5, %v1422_v7 }
 0x2f7   :  { %v1689_v16 = vpop.f32.mrb[47].mxu1  ;;  %v1753_v17 = vpop.f32.mrb[63].mxu0 }
 0x2f8   :  { %v1283_v18 = vadd.f32 %v1687_v12, %v2309_v10  ;;  %v1690_v19 = vadd.f32 %v1689_v16, %v1688_v34  ;;  %v1754_v20 = vadd.f32 %v1753_v17, %v1752_v53  ;;  %v1461_v21 = vmul.f32 %v2316_v28, %v1438_v15 }
 0x2f9   :  { %v1439_v23 = vmax.f32 %v1375_v8, %v1423_v11 }
 0x2fa   :  { %v1380_v24 = vadd.f32 %v1751_v14, %v1283_v18  ;;  %v1286_v25 = vadd.f32 %v1690_v19, %v2309_v10  ;;  %1481 = vadd.xlane.f32.xlu0 %v1461_v21 }
 0x2fb   :  { %v1462_v36 = vmul.f32 %v2316_v28, %v1439_v23 }
 0x2fc   :  { %v1424_v22 = vmul.f32 0.1, %v1380_v24  ;;  %v1383_v26 = vadd.f32 %v1754_v20, %v1286_v25  ;;  %v1691_v1 = vpop.f32.mrb[48].mxu1  ;;  %v1755_v63 = vpop.f32.mrb[64].mxu0 }
 0x2fd   :  { %1483 = vadd.xlane.f32.xlu1 %v1462_v36  ;;  %v1692_v29 = vpop.f32.mrb[49].mxu1  ;;  %v1756_v27 = vpop.f32.mrb[65].mxu0 }
 0x2fe   :  { %v1425_v30 = vmul.f32 0.1, %v1383_v26  ;;  %v1693_v31 = vadd.f32 %v1692_v29, %v1691_v1  ;;  %v1757_v60 = vadd.f32 %v1756_v27, %v1755_v63  ;;  %v1694_v3 = vpop.f32.mrb[50].mxu1  ;;  %v1758_v37 = vpop.f32.mrb[66].mxu0  ;;  %v1440_v39 = vmax.f32 %v1380_v24, %v1424_v22 }
 0x2ff   :  { %v1695_v41 = vpop.f32.mrb[51].mxu1  ;;  %v1759_v42 = vpop.f32.mrb[67].mxu0 }
 0x300   :  { %v1291_v43 = vadd.f32 %v1693_v31, %v2309_v10  ;;  %v1696_v44 = vadd.f32 %v1695_v41, %v1694_v3  ;;  %v1760_v45 = vadd.f32 %v1759_v42, %v1758_v37  ;;  %v1463_v40 = vmul.f32 %v2316_v28, %v1440_v39 }
 0x301   :  { %v1441_v46 = vmax.f32 %v1383_v26, %v1425_v30 }
 0x302   :  { %v1388_v47 = vadd.f32 %v1757_v60, %v1291_v43  ;;  %v1294_v54 = vadd.f32 %v1696_v44, %v2309_v10  ;;  %1485 = vadd.xlane.f32.xlu0 %v1463_v40 }
 0x303   :  { %v1464_v35 = vmul.f32 %v2316_v28, %v1441_v46 }
 0x304   :  { %v1426_v13 = vmul.f32 0.1, %v1388_v47  ;;  %v1391_v59 = vadd.f32 %v1760_v45, %v1294_v54  ;;  %v1697_v55 = vpop.f32.mrb[52].mxu1  ;;  %v1761_v56 = vpop.f32.mrb[68].mxu0 }
 0x305   :  { %1487 = vadd.xlane.f32.xlu1 %v1464_v35  ;;  %v1698_v32 = vpop.f32.mrb[53].mxu1  ;;  %v1762_v57 = vpop.f32.mrb[69].mxu0 }
 0x306   :  { %v1427_v58 = vmul.f32 0.1, %v1391_v59  ;;  %v1699_v38 = vadd.f32 %v1698_v32, %v1697_v55  ;;  %v1763_v61 = vadd.f32 %v1762_v57, %v1761_v56  ;;  %v1700_v62 = vpop.f32.mrb[54].mxu1  ;;  %v1764_v0 = vpop.f32.mrb[70].mxu0  ;;  %v1442_v2 = vmax.f32 %v1388_v47, %v1426_v13 }
 0x307   :  { %v1701_v49 = vpop.f32.mrb[55].mxu1  ;;  %v1765_v4 = vpop.f32.mrb[71].mxu0 }
 0x308   :  { %v1299_v50 = vadd.f32 %v1699_v38, %v2309_v10  ;;  %v1702_v5 = vadd.f32 %v1701_v49, %v1700_v62  ;;  %v1766_v6 = vadd.f32 %v1765_v4, %v1764_v0  ;;  %v1465_v7 = vmul.f32 %v2316_v28, %v1442_v2  ;;  %v1634_v0 = vld [vmem:[#allocation3] ss:$0 sm:$0xff] }
 0x309   :  { %v1443_v8 = vmax.f32 %v1391_v59, %v1427_v58 }
 0x30a   :  { %v1396_v9 = vadd.f32 %v1763_v61, %v1299_v50  ;;  %v1302_v51 = vadd.f32 %v1702_v5, %v2309_v10  ;;  %1489 = vadd.xlane.f32.xlu0 %v1465_v7 }
 0x30b   :  { %v1466_v52 = vmul.f32 %v2316_v28, %v1443_v8 }
 0x30c   :  { %v1428_v33 = vmul.f32 0.1, %v1396_v9  ;;  %v1399_v48 = vadd.f32 %v1766_v6, %v1302_v51  ;;  %v1703_v11 = vpop.f32.mrb[56].mxu1 }
 0x30d   :  { %1491 = vadd.xlane.f32.xlu1 %v1466_v52  ;;  %v1704_v12 = vpop.f32.mrb[57].mxu1 }
 0x30e   :  { %v1429_v14 = vmul.f32 0.1, %v1399_v48  ;;  %v1705_v34 = vadd.f32 %v1704_v12, %v1703_v11  ;;  %v1706_v53 = vpop.f32.mrb[58].mxu1  ;;  %v1444_v15 = vmax.f32 %v1396_v9, %v1428_v33 }
 0x30f   :  { %v1707_v16 = vpop.f32.mrb[59].mxu1 }
 0x310   :  { %v1708_v17 = vadd.f32 %v1707_v16, %v1706_v53  ;;  %v1467_v18 = vmul.f32 %v2316_v28, %v1444_v15  ;;  %v1445_v19 = vmax.f32 %v1399_v48, %v1429_v14  ;;  %v1307_v30 = vadd.f32 %v1705_v34, %v2309_v10 }
 0x312   :  { %v1310_v20 = vadd.f32 %v1708_v17, %v2309_v10  ;;  %1493 = vadd.xlane.f32.xlu0 %v1467_v18  ;;  %v1468_v21 = vmul.f32 %v2316_v28, %v1445_v19 }
 0x314   :  { %v1709_v23 = vpop.f32.mrb[60].mxu1  ;;  %1495 = vadd.xlane.f32.xlu1 %v1468_v21 }
 0x315   :  { %v1710_v24 = vpop.f32.mrb[61].mxu1 }
 0x316   :  { %v1711_v25 = vadd.f32 %v1710_v24, %v1709_v23  ;;  %v1712_v36 = vpop.f32.mrb[62].mxu1 }
 0x317   :  { %v1713_v22 = vpop.f32.mrb[63].mxu1 }
 0x318   :  { %v1315_v26 = vadd.f32 %v1711_v25, %v2309_v10  ;;  %v1714_v1 = vadd.f32 %v1713_v22, %v1712_v36 }
 0x31a   :  { %v1318_v63 = vadd.f32 %v1714_v1, %v2309_v10 }
 0x31c   :  { %v1767_v29 = vpop.f32.mrb[64].mxu1 }
 0x31d   :  { %v1768_v27 = vpop.f32.mrb[65].mxu1 }
 0x31e   :  { %v1769_v31 = vadd.f32 %v1768_v27, %v1767_v29  ;;  %v1770_v60 = vpop.f32.mrb[66].mxu1 }
 0x31f   :  { %v1771_v3 = vpop.f32.mrb[67].mxu1 }
 0x320   :  { %v1404_v37 = vadd.f32 %v1769_v31, %v1307_v30  ;;  %v1772_v39 = vadd.f32 %v1771_v3, %v1770_v60 }
 0x322   :  { %v1430_v41 = vmul.f32 0.1, %v1404_v37  ;;  %v1407_v42 = vadd.f32 %v1772_v39, %v1310_v20 }
 0x324   :  { %v1431_v43 = vmul.f32 0.1, %v1407_v42  ;;  %v1773_v44 = vpop.f32.mrb[68].mxu1  ;;  %v1446_v45 = vmax.f32 %v1404_v37, %v1430_v41 }
 0x325   :  { %v1774_v40 = vpop.f32.mrb[69].mxu1 }
 0x326   :  { %v1775_v46 = vadd.f32 %v1774_v40, %v1773_v44  ;;  %v1776_v47 = vpop.f32.mrb[70].mxu1  ;;  %v1469_v54 = vmul.f32 %v2316_v28, %v1446_v45  ;;  %v1447_v35 = vmax.f32 %v1407_v42, %v1431_v43 }
 0x327   :  { %v1777_v13 = vpop.f32.mrb[71].mxu1 }
 0x328   :  { %v1412_v59 = vadd.f32 %v1775_v46, %v1315_v26  ;;  %v1778_v55 = vadd.f32 %v1777_v13, %v1776_v47  ;;  %1497 = vadd.xlane.f32.xlu0 %v1469_v54  ;;  %v1470_v10 = vmul.f32 %v2316_v28, %v1447_v35 }
 0x32a   :  { %v1432_v56 = vmul.f32 0.1, %v1412_v59  ;;  %v1415_v32 = vadd.f32 %v1778_v55, %v1318_v63  ;;  %1499 = vadd.xlane.f32.xlu1 %v1470_v10 }
 0x32c   :  { %v1433_v57 = vmul.f32 0.1, %v1415_v32  ;;  %v1448_v58 = vmax.f32 %v1412_v59, %v1432_v56 }
 0x32e   :  { %v1471_v38 = vmul.f32 %v2316_v28, %v1448_v58  ;;  %v1449_v61 = vmax.f32 %v1415_v32, %v1433_v57 }
 0x330   :  { %1501 = vadd.xlane.f32.xlu0 %v1471_v38  ;;  %v1472_v62 = vmul.f32 %v2316_v28, %v1449_v61 }
 0x332   :  { %1503 = vadd.xlane.f32.xlu1 %v1472_v62 }
 0x377   :  { %v1474_v2 = vpop.xlane.xlu0 %1473 }
 0x378   :  { %v1512_v49 = vadd.f32 %v1634_v0, %v1474_v2 }
 0x37a   :  { %1529 = vst.msk [vmem:[%s2421_s9] sm:$0xff] %vm1528_vm2, %v1512_v49 }
 0x37b   :  { %v1476_v4 = vpop.xlane.xlu0 %1475 }
 0x37c   :  { %v1513_v50 = vadd.f32 %v1634_v0, %v1476_v4 }
 0x37e   :  { %1530 = vst.msk [vmem:[%s2421_s9 + $0x8] sm:$0xff] %vm1528_vm2, %v1513_v50 }
 0x37f   :  { %v1478_v5 = vpop.xlane.xlu1 %1477 }
 0x380   :  { %v1514_v6 = vadd.f32 %v1634_v0, %v1478_v5 }
 0x382   :  { %1531 = vst.msk [vmem:[%s2421_s9 + $0x10] sm:$0xff] %vm1528_vm2, %v1514_v6 }
 0x383   :  { %v1480_v28 = vpop.xlane.xlu1 %1479 }
 0x384   :  { %v1515_v7 = vadd.f32 %v1634_v0, %v1480_v28 }
 0x386   :  { %1532 = vst.msk [vmem:[%s2421_s9 + $0x18] sm:$0xff] %vm1528_vm2, %v1515_v7 }
 0x387   :  { %v1482_v8 = vpop.xlane.xlu0 %1481 }
 0x388   :  { %v1516_v9 = vadd.f32 %v1634_v0, %v1482_v8 }
 0x38a   :  { %1533 = vst.msk [vmem:[%s2421_s9 + $0x20] sm:$0xff] %vm1528_vm2, %v1516_v9  ;;  %v1484_v51 = vpop.xlane.xlu1 %1483 }
 0x38b   :  { %v1517_v52 = vadd.f32 %v1634_v0, %v1484_v51 }
 0x38d   :  { %1534 = vst.msk [vmem:[%s2421_s9 + $0x28] sm:$0xff] %vm1528_vm2, %v1517_v52 }
 0x38f   :  { %v1486_v33 = vpop.xlane.xlu0 %1485 }
 0x390   :  { %v1518_v48 = vadd.f32 %v1634_v0, %v1486_v33 }
 0x392   :  { %1535 = vst.msk [vmem:[%s2421_s9 + $0x30] sm:$0xff] %vm1528_vm2, %v1518_v48  ;;  %v1488_v11 = vpop.xlane.xlu1 %1487 }
 0x393   :  { %v1519_v12 = vadd.f32 %v1634_v0, %v1488_v11 }
 0x395   :  { %1536 = vst.msk [vmem:[%s2421_s9 + $0x38] sm:$0xff] %vm1528_vm2, %v1519_v12 }
 0x397   :  { %v1490_v14 = vpop.xlane.xlu0 %1489 }
 0x398   :  { %v1520_v34 = vadd.f32 %v1634_v0, %v1490_v14 }
 0x39a   :  { %1537 = vst.msk [vmem:[%s2421_s9 + $0x40] sm:$0xff] %vm1528_vm2, %v1520_v34  ;;  %v1492_v53 = vpop.xlane.xlu1 %1491 }
 0x39b   :  { %v1521_v15 = vadd.f32 %v1634_v0, %v1492_v53 }
 0x39d   :  { %1538 = vst.msk [vmem:[%s2421_s9 + $0x48] sm:$0xff] %vm1528_vm2, %v1521_v15 }
 0x39f   :  { %v1494_v16 = vpop.xlane.xlu0 %1493 }
 0x3a0   :  { %v1522_v17 = vadd.f32 %v1634_v0, %v1494_v16 }
 0x3a1   :  { %v1496_v18 = vpop.xlane.xlu1 %1495 }
 0x3a2   :  { %1539 = vst.msk [vmem:[%s2421_s9 + $0x50] sm:$0xff] %vm1528_vm2, %v1522_v17  ;;  %v1523_v19 = vadd.f32 %v1634_v0, %v1496_v18 }
 0x3a4   :  { %1540 = vst.msk [vmem:[%s2421_s9 + $0x58] sm:$0xff] %vm1528_vm2, %v1523_v19 }
 0x3b5   :  { %v1498_v20 = vpop.xlane.xlu0 %1497 }
 0x3b6   :  { %v1524_v21 = vadd.f32 %v1634_v0, %v1498_v20 }
 0x3b7   :  { %v1500_v23 = vpop.xlane.xlu1 %1499 }
 0x3b8   :  { %1541 = vst.msk [vmem:[%s2421_s9 + $0x60] sm:$0xff] %vm1528_vm2, %v1524_v21  ;;  %v1525_v24 = vadd.f32 %v1634_v0, %v1500_v23 }
 0x3ba   :  { %1542 = vst.msk [vmem:[%s2421_s9 + $0x68] sm:$0xff] %vm1528_vm2, %v1525_v24 }
 0x3bd   :  { %v1502_v25 = vpop.xlane.xlu0 %1501 }
 0x3be   :  { %v1526_v36 = vadd.f32 %v1634_v0, %v1502_v25 }
 0x3bf   :  { %v1504_v22 = vpop.xlane.xlu1 %1503 }
 0x3c0   :  { %1543 = vst.msk [vmem:[%s2421_s9 + $0x70] sm:$0xff] %vm1528_vm2, %v1526_v36  ;;  %v1527_v26 = vadd.f32 %v1634_v0, %v1504_v22 }
 0x3c2   :  { %1544 = vst.msk [vmem:[%s2421_s9 + $0x78] sm:$0xff] %vm1528_vm2, %v1527_v26 }
 0x3c3   :  { %1549 = vsyncpa [#allocation5], 1 }
 0x3c4   :  { %1550 = vsyncpa [#allocation7], 1 }

</bundles_post_ra>
